<compile_context>
chip_gen: v6e
topology: v6e:2x2x1
jax: 0.10.0
libtpu: 0.0.40
codegen_flags: <defaults>
</compile_context>

<pallas_src>
import numpy as np

import jax
import jax.numpy as jnp
from jax.experimental import pallas as pl
from jax.experimental.pallas import tpu as pltpu

BN_EPS = 1e-5


def _se_basic_block_kernel(
    x_ref,                     # [N, H/2, L] f32   fused input, L = 2*W*C (residual source)
    bw1_ref,                   # [2L, L] bf16      banded conv1 weights (K-stacked taps)
    g1_ref, be1_ref,           # [1, C] f32        bn1 gamma / beta
    bw2_ref,                   # [2L, L] bf16      banded conv2 weights
    g2_ref, be2_ref,           # [1, C] f32        bn2 gamma / beta
    fc1w_ref, fc1b_ref,        # [C, R], [1, R]    SE fc1 (weight pre-transposed)
    pa_ref,                    # [1, 1]            PReLU slope
    fc2w_ref, fc2b_ref,        # [R, C], [1, C]    SE fc2 (weight pre-transposed)
    expand_ref,                # [C, L] f32        0/1 channel -> lane expand
    foldc_ref,                 # [2L, 2C] f32      0/1 block-diag lane -> channel fold
    seg_ref,                   # [N, N*H/2] f32    0/1 row -> sample segment matrix
    out_ref,                   # [N, H/2, L] f32
):
    N, HH, L = x_ref.shape
    C = expand_ref.shape[0]
    WC = L // 2
    M = N * HH
    inv_M = float(C) / float(M * L)        # 1 / (N*H*W)
    inv_HW = float(C) / float(HH * L)      # 1 / (H*W)

    expand = expand_ref[...]
    foldc = foldc_ref[...]
    seg = seg_ref[...]

    def conv3x3(act, bw_ref):
        # act: [N, HH, L] in output-pair layout (lane = parity*W*C + w*C + c).
        # Build the K-stacked LHS as a value: lane block s (s = 0..3, each WC
        # wide) of row (n, p) holds input row 2p-1+s, zero at the image
        # top/bottom.  One MXU dot then applies all nine taps for BOTH output
        # rows of the pair (K = 4*W*C = 2L, Nout = 2*W*C = L).  Boundary dx
        # taps fall outside the row and are absent from the banded weight, so
        # no lane halo is needed.  Cast to bf16 once, accumulate in f32.
        top = act[:, :, WC:]                # odd spatial rows 1, 3, ..., H-1
        bot = act[:, :, :WC]                # even rows 0, 2, ..., H-2
        z = jnp.zeros((N, 1, WC), jnp.float32)
        lhs = jnp.concatenate(
            [jnp.concatenate([z, top[:, :HH - 1, :]], axis=1),   # rows 2p-1
             bot,                                                # rows 2p
             top,                                                # rows 2p+1
             jnp.concatenate([bot[:, 1:, :], z], axis=1)],       # rows 2p+2
            axis=-1).reshape(M, 2 * L).astype(jnp.bfloat16)
        return jnp.dot(lhs, bw_ref[...],
                       preferred_element_type=jnp.float32)       # [M, L] f32

    def bn_stats(y2d):
        # Per-sample channel sums of y and y^2 with two MXU dots (sums and
        # sums-of-squares are lane-concatenated; the fold matrix is
        # block-diagonal so one dot separates them back out per channel).
        ycat = jnp.concatenate([y2d, y2d * y2d], axis=-1)              # [M, 2L]
        samp = jnp.dot(seg, ycat, preferred_element_type=jnp.float32)  # [N, 2L]
        sampc = jnp.dot(samp, foldc, preferred_element_type=jnp.float32)  # [N, 2C]
        s_sum, s_sq = sampc[:, :C], sampc[:, C:]
        mean = jnp.sum(s_sum, axis=0, keepdims=True) * inv_M           # [1, C]
        var = jnp.sum(s_sq, axis=0, keepdims=True) * inv_M - mean * mean
        var = jnp.maximum(var, 0.0)
        # TODO(synk): E[x^2]-mean^2 can cancel for large-mean activations; a
        # tiled production version should use a centered second pass.
        return mean, var, s_sum

    def bn_affine(mean, var, g_ref, be_ref):
        scale = g_ref[...] * jax.lax.rsqrt(var + BN_EPS)               # [1, C]
        shift = be_ref[...] - mean * scale                             # [1, C]
        return scale, shift

    x_f = x_ref[...]                        # f32, kept live for the residual

    # conv1 -> bn1 -> relu   (conv bias omitted: cancelled by batch-stat BN)
    y1 = conv3x3(x_f, bw1_ref)                                         # [M, L]
    mean1, var1, _ = bn_stats(y1)
    sc1, sh1 = bn_affine(mean1, var1, g1_ref, be1_ref)
    ss1 = jnp.dot(jnp.concatenate([sc1, sh1], axis=0), expand,
                  preferred_element_type=jnp.float32)                  # [2, L]
    a1 = jnp.maximum(y1 * ss1[0:1, :] + ss1[1:2, :], 0.0)              # [M, L]

    # conv2 -> bn2 (bn2 affine deferred: fused with the SE scale below)
    y2 = conv3x3(a1.reshape(N, HH, L), bw2_ref)                        # [M, L]
    mean2, var2, samp2 = bn_stats(y2)
    sc2, sh2 = bn_affine(mean2, var2, g2_ref, be2_ref)

    # SE squeeze: the global average pool of the bn2 output is derived from the
    # per-sample conv2 sums already computed for bn2 (BN is a per-channel
    # affine), so the pool costs no extra full-tensor pass.
    pooled = samp2 * inv_HW * sc2 + sh2                                # [N, C]
    h1 = jnp.dot(pooled, fc1w_ref[...],
                 preferred_element_type=jnp.float32) + fc1b_ref[...]   # [N, R]
    h1 = jnp.maximum(h1, 0.0) + pa_ref[...] * jnp.minimum(h1, 0.0)     # PReLU
    s = jax.nn.sigmoid(jnp.dot(h1, fc2w_ref[...],
                               preferred_element_type=jnp.float32)
                       + fc2b_ref[...])                                # [N, C]

    # Fuse the SE rescale into the bn2 affine: out = y2*(s*sc2) + (s*sh2) + x.
    # One batched channel->lane expand for both per-sample scale and shift.
    ss2 = jnp.dot(jnp.concatenate([s * sc2, s * sh2], axis=0), expand,
                  preferred_element_type=jnp.float32)                  # [2N, L]
    scl = ss2[:N].reshape(N, 1, L)
    shl = ss2[N:].reshape(N, 1, L)
    out = y2.reshape(N, HH, L) * scl + shl + x_f
    out_ref[...] = jnp.maximum(out, 0.0)                               # lane-dense store


def _band_weights(w_hwio, W):
    """[3, 3, Cin, Cout] conv weights -> K-stacked two-row banded matrix.

    Shape [4*W*Cin, 2*W*Cout].  The conv LHS row for output pair p is the lane
    concatenation of the four (zero-padded) input rows 2p-1 .. 2p+2, each
    W*Cin wide (no lane halo).  Column block o selects output row 2p+o.
      B[s*W*Cin + ws*Cin + ci, o*W*Cout + wd*Cout + co]
        = w[(s-o-1)+1, (ws-wd)+1, ci, co]   when both tap indices are valid,
    so a single matmul applies all nine taps and the Cin->Cout mixing for both
    rows of the pair; boundary (dx = +-1) taps outside the row are absent.
    """
    _, _, Cin, Cout = w_hwio.shape
    s = np.arange(4)[:, None]           # slab row  (input row 2p-1+s)
    o = np.arange(2)[None, :]           # output row within the pair
    dy = s - o                          # = dy_tap + 1, valid in {0,1,2}
    ws = np.arange(W)[:, None]
    wd = np.arange(W)[None, :]
    dx = ws - wd + 1                    # = dx_tap + 1, valid in {0,1,2}
    mask = ((dy >= 0) & (dy <= 2))[:, :, None, None] & \
           ((dx >= 0) & (dx <= 2))[None, None, :, :]          # [4,2,W,W]
    band = w_hwio[np.clip(dy, 0, 2)[:, :, None, None],
                  np.clip(dx, 0, 2)[None, None, :, :]]        # [4,2,W,W,Cin,Cout]
    band = band * mask[..., None, None].astype(np.float32)
    band = jnp.transpose(band, (0, 2, 4, 1, 3, 5))            # [4,W,Cin,2,W,Cout]
    return band.reshape(4 * W * Cin, 2 * W * Cout)


@jax.jit
def se_basic_block(x_nchw, params):
    """SEBasicBlock forward (stride=1, downsample=None). x: [N, C, H, W] f32, H even."""
    N, C, H, W = x_nchw.shape
    HH = H // 2
    L = 2 * W * C                      # 128-lane-dense minor dim (two rows / lane-row)
    M = N * HH
    R = params["fc1w"].shape[1]

    # Boundary relayout NCHW -> [N, H/2, 2*W*C], done once in XLA.
    x_f = jnp.transpose(x_nchw, (0, 2, 3, 1)).reshape(N, HH, L).astype(jnp.float32)

    bw1 = _band_weights(params["w1"], W).astype(jnp.bfloat16)          # [2L, L]
    bw2 = _band_weights(params["w2"], W).astype(jnp.bfloat16)
    fold2 = jnp.tile(jnp.eye(C, dtype=jnp.float32), (2 * W, 1))        # [L, C]
    expand = fold2.T                                                   # [C, L]
    foldc = jnp.kron(jnp.eye(2, dtype=jnp.float32), fold2)             # [2L, 2C]
    seg = jnp.repeat(jnp.eye(N, dtype=jnp.float32), HH, axis=1)        # [N, N*HH]

    args = (x_f, bw1, params["g1"], params["be1"],
            bw2, params["g2"], params["be2"],
            params["fc1w"], params["fc1b"], params["pa"],
            params["fc2w"], params["fc2b"],
            expand, foldc, seg)

    flops = (2 * (2 * M * (2 * L) * L)                                  # conv dots
             + 2 * (2 * N * M * (2 * L) + 2 * N * (2 * L) * (2 * C))    # BN stats dots
             + 2 * 2 * N * C * L + 4 * N * C * R                        # expands + SE fc
             + 14 * N * H * W * C)                                      # elementwise
    cost = pl.CostEstimate(
        flops=int(flops),
        transcendentals=int(N * C + 2 * C),
        bytes_accessed=int(2 * N * HH * L * 4 + 2 * (2 * L) * L * 2 + 4096))

    out_f = pl.pallas_call(
        _se_basic_block_kernel,
        out_shape=jax.ShapeDtypeStruct((N, HH, L), jnp.float32),
        in_specs=[pl.BlockSpec(memory_space=pltpu.MemorySpace.VMEM)
                  for _ in args],
        out_specs=pl.BlockSpec(memory_space=pltpu.MemorySpace.VMEM),
        cost_estimate=cost,
    )(*args)

    return jnp.transpose(out_f.reshape(N, H, W, C), (0, 3, 1, 2))       # back to NCHW


# ---------------- pure-JAX reference (for correctness check) ----------------
def _ref_forward(x_nchw, p):
    """Reference forward.  Mirrors the kernel's MXU precision policy (conv
    operands cast to bf16, f32 accumulation) so the comparison stays tight;
    everything else — including the conv biases the kernel drops because
    batch-statistics BN cancels them — is the exact f32 training-mode forward
    of the PyTorch module."""
    def conv(x, w, b):                      # w: [3,3,Cin,Cout] -> OIHW
        w_oihw = jnp.transpose(w, (3, 2, 0, 1)).astype(jnp.bfloat16)
        y = jax.lax.conv_general_dilated(
            x.astype(jnp.bfloat16), w_oihw, (1, 1), "SAME",
            dimension_numbers=("NCHW", "OIHW", "NCHW"),
            preferred_element_type=jnp.float32)
        return y + b.reshape(1, -1, 1, 1)

    def bn(y, g, be):
        mean = jnp.mean(y, axis=(0, 2, 3), keepdims=True)
        var = jnp.mean((y - mean) ** 2, axis=(0, 2, 3), keepdims=True)
        return ((y - mean) * jax.lax.rsqrt(var + BN_EPS)
                * g.reshape(1, -1, 1, 1) + be.reshape(1, -1, 1, 1))

    out = jnp.maximum(bn(conv(x_nchw, p["w1"], p["b1"]), p["g1"], p["be1"]), 0.0)
    out = bn(conv(out, p["w2"], p["b2"]), p["g2"], p["be2"])
    pooled = jnp.mean(out, axis=(2, 3))                                 # [N, C]
    h = pooled @ p["fc1w"] + p["fc1b"]
    h = jnp.maximum(h, 0.0) + p["pa"][0, 0] * jnp.minimum(h, 0.0)
    s = jax.nn.sigmoid(h @ p["fc2w"] + p["fc2b"])
    out = out * s[:, :, None, None]
    return jnp.maximum(out + x_nchw, 0.0)


def _init_params(key, channels, reduction):
    ks = jax.random.split(key, 12)
    C, R = channels, reduction
    return {
        "w1":   0.1 * jax.random.normal(ks[0], (3, 3, C, C), jnp.float32),
        "b1":   0.1 * jax.random.normal(ks[1], (1, C), jnp.float32),
        "g1":   1.0 + 0.1 * jax.random.normal(ks[2], (1, C), jnp.float32),
        "be1":  0.1 * jax.random.normal(ks[3], (1, C), jnp.float32),
        "w2":   0.1 * jax.random.normal(ks[4], (3, 3, C, C), jnp.float32),
        "b2":   0.1 * jax.random.normal(ks[5], (1, C), jnp.float32),
        "g2":   1.0 + 0.1 * jax.random.normal(ks[6], (1, C), jnp.float32),
        "be2":  0.1 * jax.random.normal(ks[7], (1, C), jnp.float32),
        "fc1w": 0.1 * jax.random.normal(ks[8], (C, R), jnp.float32),
        "fc1b": 0.1 * jax.random.normal(ks[9], (1, R), jnp.float32),
        "pa":   jnp.full((1, 1), 0.25, jnp.float32),   # PReLU default init
        "fc2w": 0.1 * jax.random.normal(ks[10], (R, C), jnp.float32),
        "fc2b": 0.1 * jax.random.normal(ks[11], (1, C), jnp.float32),
    }


if __name__ == "__main__":
    N, C, H, W = 2, 4, 16, 16          # inplanes = planes = 4, stride = 1
    REDUCTION = 16

    key = jax.random.PRNGKey(0)
    kx, kp = jax.random.split(key)
    x = jax.random.normal(kx, (N, C, H, W), jnp.float32)
    params = _init_params(kp, C, REDUCTION)

    out = jax.block_until_ready(se_basic_block(x, params))
    ref = jax.block_until_ready(_ref_forward(x, params))

    assert out.shape == (N, C, H, W)
    diff = jnp.abs(out - ref)
    max_d, mean_d = float(jnp.max(diff)), float(jnp.mean(diff))
    # Typical agreement is ~1e-5; the loose max bound only covers the rare case
    # where the kernel's and reference's (slightly different) f32 conv1 outputs
    # round to adjacent bf16 values when re-quantized as conv2's input.
    assert max_d < 3e-2 and mean_d < 1e-3, (max_d, mean_d)
    print("KERNEL_OK")
</pallas_src>

<mosaic_0001>
module attributes {stable_mosaic.version = 11 : i64} {
  func.func @_se_basic_block_kernel(%arg0: memref<2x8x128xf32, #tpu.memory_space<vmem>>, %arg1: memref<256x128xbf16, #tpu.memory_space<vmem>>, %arg2: memref<1x4xf32, #tpu.memory_space<vmem>>, %arg3: memref<1x4xf32, #tpu.memory_space<vmem>>, %arg4: memref<256x128xbf16, #tpu.memory_space<vmem>>, %arg5: memref<1x4xf32, #tpu.memory_space<vmem>>, %arg6: memref<1x4xf32, #tpu.memory_space<vmem>>, %arg7: memref<4x16xf32, #tpu.memory_space<vmem>>, %arg8: memref<1x16xf32, #tpu.memory_space<vmem>>, %arg9: memref<1x1xf32, #tpu.memory_space<vmem>>, %arg10: memref<16x4xf32, #tpu.memory_space<vmem>>, %arg11: memref<1x4xf32, #tpu.memory_space<vmem>>, %arg12: memref<4x128xf32, #tpu.memory_space<vmem>>, %arg13: memref<256x8xf32, #tpu.memory_space<vmem>>, %arg14: memref<2x16xf32, #tpu.memory_space<vmem>>, %arg15: memref<2x8x128xf32, #tpu.memory_space<vmem>>) attributes {dimension_semantics = [], scalar_prefetch = 0 : i64, scratch_operands = 0 : i64, tpu.core_type = #tpu.core_type<tc>} {
    %c0 = arith.constant 0 : index
    %c0_0 = arith.constant 0 : index
    %0 = vector.load %arg12[%c0, %c0_0] : memref<4x128xf32, #tpu.memory_space<vmem>>, vector<4x128xf32>
    %c0_1 = arith.constant 0 : index
    %c0_2 = arith.constant 0 : index
    %1 = vector.load %arg13[%c0_1, %c0_2] : memref<256x8xf32, #tpu.memory_space<vmem>>, vector<256x8xf32>
    %c0_3 = arith.constant 0 : index
    %c0_4 = arith.constant 0 : index
    %2 = vector.load %arg14[%c0_3, %c0_4] : memref<2x16xf32, #tpu.memory_space<vmem>>, vector<2x16xf32>
    %c0_5 = arith.constant 0 : index
    %c0_6 = arith.constant 0 : index
    %c0_7 = arith.constant 0 : index
    %3 = vector.load %arg0[%c0_5, %c0_6, %c0_7] : memref<2x8x128xf32, #tpu.memory_space<vmem>>, vector<2x8x128xf32>
    %4 = vector.extract_strided_slice %3 {offsets = [0, 0, 64], sizes = [2, 8, 64], strides = [1, 1, 1]} : vector<2x8x128xf32> to vector<2x8x64xf32>
    %5 = vector.extract_strided_slice %3 {offsets = [0, 0, 0], sizes = [2, 8, 64], strides = [1, 1, 1]} : vector<2x8x128xf32> to vector<2x8x64xf32>
    %cst = arith.constant 0.000000e+00 : f32
    %6 = vector.broadcast %cst : f32 to vector<2x1x64xf32>
    %7 = vector.extract_strided_slice %4 {offsets = [0, 0, 0], sizes = [2, 7, 64], strides = [1, 1, 1]} : vector<2x8x64xf32> to vector<2x7x64xf32>
    %8 = tpu.concatenate %6, %7 in 1 : vector<2x1x64xf32>, vector<2x7x64xf32> -> vector<2x8x64xf32>
    %9 = vector.extract_strided_slice %5 {offsets = [0, 1, 0], sizes = [2, 7, 64], strides = [1, 1, 1]} : vector<2x8x64xf32> to vector<2x7x64xf32>
    %10 = tpu.concatenate %9, %6 in 1 : vector<2x7x64xf32>, vector<2x1x64xf32> -> vector<2x8x64xf32>
    %11 = tpu.concatenate %8, %5, %4, %10 in 2 : vector<2x8x64xf32>, vector<2x8x64xf32>, vector<2x8x64xf32>, vector<2x8x64xf32> -> vector<2x8x256xf32>
    %12 = vector.shape_cast %11 : vector<2x8x256xf32> to vector<16x256xf32>
    %13 = arith.truncf %12 : vector<16x256xf32> to vector<16x256xbf16>
    %c0_8 = arith.constant 0 : index
    %c0_9 = arith.constant 0 : index
    %14 = vector.load %arg1[%c0_8, %c0_9] : memref<256x128xbf16, #tpu.memory_space<vmem>>, vector<256x128xbf16>
    %cst_10 = arith.constant dense<0.000000e+00> : vector<16x128xf32>
    %15 = tpu.matmul %13, %14, %cst_10 {dimension_numbers = #tpu.dot_dimension_numbers<[1], [0], [0], [1], [0, 0, 1, 1], [], []>} : vector<16x256xbf16>, vector<256x128xbf16>, vector<16x128xf32> -> vector<16x128xf32>
    %16 = arith.mulf %15, %15 : vector<16x128xf32>
    %17 = tpu.concatenate %15, %16 in 1 : vector<16x128xf32>, vector<16x128xf32> -> vector<16x256xf32>
    %cst_11 = arith.constant dense<0.000000e+00> : vector<2x256xf32>
    %18 = tpu.matmul %2, %17, %cst_11 {dimension_numbers = #tpu.dot_dimension_numbers<[1], [0], [0], [1], [0, 0, 1, 1], [], []>} : vector<2x16xf32>, vector<16x256xf32>, vector<2x256xf32> -> vector<2x256xf32>
    %cst_12 = arith.constant dense<0.000000e+00> : vector<2x8xf32>
    %19 = tpu.matmul %18, %1, %cst_12 {dimension_numbers = #tpu.dot_dimension_numbers<[1], [0], [0], [1], [0, 0, 1, 1], [], []>} : vector<2x256xf32>, vector<256x8xf32>, vector<2x8xf32> -> vector<2x8xf32>
    %20 = vector.extract_strided_slice %19 {offsets = [0, 0], sizes = [2, 4], strides = [1, 1]} : vector<2x8xf32> to vector<2x4xf32>
    %21 = vector.extract_strided_slice %19 {offsets = [0, 4], sizes = [2, 4], strides = [1, 1]} : vector<2x8xf32> to vector<2x4xf32>
    %cst_13 = arith.constant dense<0.000000e+00> : vector<4xf32>
    %22 = vector.multi_reduction <add>, %20, %cst_13 [0] : vector<2x4xf32> to vector<4xf32>
    %23 = vector.shape_cast %22 : vector<4xf32> to vector<1x4xf32>
    %cst_14 = arith.constant 0.001953125 : f32
    %24 = vector.broadcast %cst_14 : f32 to vector<1x4xf32>
    %25 = arith.mulf %23, %24 : vector<1x4xf32>
    %cst_15 = arith.constant dense<0.000000e+00> : vector<4xf32>
    %26 = vector.multi_reduction <add>, %21, %cst_15 [0] : vector<2x4xf32> to vector<4xf32>
    %27 = vector.shape_cast %26 : vector<4xf32> to vector<1x4xf32>
    %cst_16 = arith.constant 0.001953125 : f32
    %28 = vector.broadcast %cst_16 : f32 to vector<1x4xf32>
    %29 = arith.mulf %27, %28 : vector<1x4xf32>
    %30 = arith.mulf %25, %25 : vector<1x4xf32>
    %31 = arith.subf %29, %30 : vector<1x4xf32>
    %cst_17 = arith.constant 0.000000e+00 : f32
    %32 = vector.broadcast %cst_17 : f32 to vector<1x4xf32>
    %33 = arith.maximumf %31, %32 : vector<1x4xf32>
    %c0_18 = arith.constant 0 : index
    %c0_19 = arith.constant 0 : index
    %34 = vector.load %arg2[%c0_18, %c0_19] : memref<1x4xf32, #tpu.memory_space<vmem>>, vector<1x4xf32>
    %cst_20 = arith.constant 9.99999974E-6 : f32
    %35 = vector.broadcast %cst_20 : f32 to vector<1x4xf32>
    %36 = arith.addf %33, %35 : vector<1x4xf32>
    %37 = math.rsqrt %36 : vector<1x4xf32>
    %38 = arith.mulf %34, %37 : vector<1x4xf32>
    %c0_21 = arith.constant 0 : index
    %c0_22 = arith.constant 0 : index
    %39 = vector.load %arg3[%c0_21, %c0_22] : memref<1x4xf32, #tpu.memory_space<vmem>>, vector<1x4xf32>
    %40 = arith.mulf %25, %38 : vector<1x4xf32>
    %41 = arith.subf %39, %40 : vector<1x4xf32>
    %42 = tpu.concatenate %38, %41 in 0 : vector<1x4xf32>, vector<1x4xf32> -> vector<2x4xf32>
    %cst_23 = arith.constant dense<0.000000e+00> : vector<2x128xf32>
    %43 = tpu.matmul %42, %0, %cst_23 {dimension_numbers = #tpu.dot_dimension_numbers<[1], [0], [0], [1], [0, 0, 1, 1], [], []>} : vector<2x4xf32>, vector<4x128xf32>, vector<2x128xf32> -> vector<2x128xf32>
    %44 = vector.extract_strided_slice %43 {offsets = [0, 0], sizes = [1, 128], strides = [1, 1]} : vector<2x128xf32> to vector<1x128xf32>
    %45 = vector.broadcast %44 : vector<1x128xf32> to vector<16x128xf32>
    %46 = arith.mulf %15, %45 : vector<16x128xf32>
    %47 = vector.extract_strided_slice %43 {offsets = [1, 0], sizes = [1, 128], strides = [1, 1]} : vector<2x128xf32> to vector<1x128xf32>
    %48 = vector.broadcast %47 : vector<1x128xf32> to vector<16x128xf32>
    %49 = arith.addf %46, %48 : vector<16x128xf32>
    %cst_24 = arith.constant 0.000000e+00 : f32
    %50 = vector.broadcast %cst_24 : f32 to vector<16x128xf32>
    %51 = arith.maximumf %49, %50 : vector<16x128xf32>
    %52 = vector.shape_cast %51 : vector<16x128xf32> to vector<2x8x128xf32>
    %53 = vector.extract_strided_slice %52 {offsets = [0, 0, 64], sizes = [2, 8, 64], strides = [1, 1, 1]} : vector<2x8x128xf32> to vector<2x8x64xf32>
    %54 = vector.extract_strided_slice %52 {offsets = [0, 0, 0], sizes = [2, 8, 64], strides = [1, 1, 1]} : vector<2x8x128xf32> to vector<2x8x64xf32>
    %cst_25 = arith.constant 0.000000e+00 : f32
    %55 = vector.broadcast %cst_25 : f32 to vector<2x1x64xf32>
    %56 = vector.extract_strided_slice %53 {offsets = [0, 0, 0], sizes = [2, 7, 64], strides = [1, 1, 1]} : vector<2x8x64xf32> to vector<2x7x64xf32>
    %57 = tpu.concatenate %55, %56 in 1 : vector<2x1x64xf32>, vector<2x7x64xf32> -> vector<2x8x64xf32>
    %58 = vector.extract_strided_slice %54 {offsets = [0, 1, 0], sizes = [2, 7, 64], strides = [1, 1, 1]} : vector<2x8x64xf32> to vector<2x7x64xf32>
    %59 = tpu.concatenate %58, %55 in 1 : vector<2x7x64xf32>, vector<2x1x64xf32> -> vector<2x8x64xf32>
    %60 = tpu.concatenate %57, %54, %53, %59 in 2 : vector<2x8x64xf32>, vector<2x8x64xf32>, vector<2x8x64xf32>, vector<2x8x64xf32> -> vector<2x8x256xf32>
    %61 = vector.shape_cast %60 : vector<2x8x256xf32> to vector<16x256xf32>
    %62 = arith.truncf %61 : vector<16x256xf32> to vector<16x256xbf16>
    %c0_26 = arith.constant 0 : index
    %c0_27 = arith.constant 0 : index
    %63 = vector.load %arg4[%c0_26, %c0_27] : memref<256x128xbf16, #tpu.memory_space<vmem>>, vector<256x128xbf16>
    %cst_28 = arith.constant dense<0.000000e+00> : vector<16x128xf32>
    %64 = tpu.matmul %62, %63, %cst_28 {dimension_numbers = #tpu.dot_dimension_numbers<[1], [0], [0], [1], [0, 0, 1, 1], [], []>} : vector<16x256xbf16>, vector<256x128xbf16>, vector<16x128xf32> -> vector<16x128xf32>
    %65 = arith.mulf %64, %64 : vector<16x128xf32>
    %66 = tpu.concatenate %64, %65 in 1 : vector<16x128xf32>, vector<16x128xf32> -> vector<16x256xf32>
    %cst_29 = arith.constant dense<0.000000e+00> : vector<2x256xf32>
    %67 = tpu.matmul %2, %66, %cst_29 {dimension_numbers = #tpu.dot_dimension_numbers<[1], [0], [0], [1], [0, 0, 1, 1], [], []>} : vector<2x16xf32>, vector<16x256xf32>, vector<2x256xf32> -> vector<2x256xf32>
    %cst_30 = arith.constant dense<0.000000e+00> : vector<2x8xf32>
    %68 = tpu.matmul %67, %1, %cst_30 {dimension_numbers = #tpu.dot_dimension_numbers<[1], [0], [0], [1], [0, 0, 1, 1], [], []>} : vector<2x256xf32>, vector<256x8xf32>, vector<2x8xf32> -> vector<2x8xf32>
    %69 = vector.extract_strided_slice %68 {offsets = [0, 0], sizes = [2, 4], strides = [1, 1]} : vector<2x8xf32> to vector<2x4xf32>
    %70 = vector.extract_strided_slice %68 {offsets = [0, 4], sizes = [2, 4], strides = [1, 1]} : vector<2x8xf32> to vector<2x4xf32>
    %cst_31 = arith.constant dense<0.000000e+00> : vector<4xf32>
    %71 = vector.multi_reduction <add>, %69, %cst_31 [0] : vector<2x4xf32> to vector<4xf32>
    %72 = vector.shape_cast %71 : vector<4xf32> to vector<1x4xf32>
    %cst_32 = arith.constant 0.001953125 : f32
    %73 = vector.broadcast %cst_32 : f32 to vector<1x4xf32>
    %74 = arith.mulf %72, %73 : vector<1x4xf32>
    %cst_33 = arith.constant dense<0.000000e+00> : vector<4xf32>
    %75 = vector.multi_reduction <add>, %70, %cst_33 [0] : vector<2x4xf32> to vector<4xf32>
    %76 = vector.shape_cast %75 : vector<4xf32> to vector<1x4xf32>
    %cst_34 = arith.constant 0.001953125 : f32
    %77 = vector.broadcast %cst_34 : f32 to vector<1x4xf32>
    %78 = arith.mulf %76, %77 : vector<1x4xf32>
    %79 = arith.mulf %74, %74 : vector<1x4xf32>
    %80 = arith.subf %78, %79 : vector<1x4xf32>
    %cst_35 = arith.constant 0.000000e+00 : f32
    %81 = vector.broadcast %cst_35 : f32 to vector<1x4xf32>
    %82 = arith.maximumf %80, %81 : vector<1x4xf32>
    %c0_36 = arith.constant 0 : index
    %c0_37 = arith.constant 0 : index
    %83 = vector.load %arg5[%c0_36, %c0_37] : memref<1x4xf32, #tpu.memory_space<vmem>>, vector<1x4xf32>
    %cst_38 = arith.constant 9.99999974E-6 : f32
    %84 = vector.broadcast %cst_38 : f32 to vector<1x4xf32>
    %85 = arith.addf %82, %84 : vector<1x4xf32>
    %86 = math.rsqrt %85 : vector<1x4xf32>
    %87 = arith.mulf %83, %86 : vector<1x4xf32>
    %c0_39 = arith.constant 0 : index
    %c0_40 = arith.constant 0 : index
    %88 = vector.load %arg6[%c0_39, %c0_40] : memref<1x4xf32, #tpu.memory_space<vmem>>, vector<1x4xf32>
    %89 = arith.mulf %74, %87 : vector<1x4xf32>
    %90 = arith.subf %88, %89 : vector<1x4xf32>
    %cst_41 = arith.constant 3.906250e-03 : f32
    %91 = vector.broadcast %cst_41 : f32 to vector<2x4xf32>
    %92 = arith.mulf %69, %91 : vector<2x4xf32>
    %93 = vector.broadcast %87 : vector<1x4xf32> to vector<2x4xf32>
    %94 = arith.mulf %92, %93 : vector<2x4xf32>
    %95 = vector.broadcast %90 : vector<1x4xf32> to vector<2x4xf32>
    %96 = arith.addf %94, %95 : vector<2x4xf32>
    %c0_42 = arith.constant 0 : index
    %c0_43 = arith.constant 0 : index
    %97 = vector.load %arg7[%c0_42, %c0_43] : memref<4x16xf32, #tpu.memory_space<vmem>>, vector<4x16xf32>
    %cst_44 = arith.constant dense<0.000000e+00> : vector<2x16xf32>
    %98 = tpu.matmul %96, %97, %cst_44 {dimension_numbers = #tpu.dot_dimension_numbers<[1], [0], [0], [1], [0, 0, 1, 1], [], []>} : vector<2x4xf32>, vector<4x16xf32>, vector<2x16xf32> -> vector<2x16xf32>
    %c0_45 = arith.constant 0 : index
    %c0_46 = arith.constant 0 : index
    %99 = vector.load %arg8[%c0_45, %c0_46] : memref<1x16xf32, #tpu.memory_space<vmem>>, vector<1x16xf32>
    %100 = vector.broadcast %99 : vector<1x16xf32> to vector<2x16xf32>
    %101 = arith.addf %98, %100 : vector<2x16xf32>
    %cst_47 = arith.constant 0.000000e+00 : f32
    %102 = vector.broadcast %cst_47 : f32 to vector<2x16xf32>
    %103 = arith.maximumf %101, %102 : vector<2x16xf32>
    %c0_48 = arith.constant 0 : index
    %c0_49 = arith.constant 0 : index
    %104 = vector.load %arg9[%c0_48, %c0_49] : memref<1x1xf32, #tpu.memory_space<vmem>>, vector<1x1xf32>
    %cst_50 = arith.constant 0.000000e+00 : f32
    %105 = vector.broadcast %cst_50 : f32 to vector<2x16xf32>
    %106 = arith.minimumf %101, %105 : vector<2x16xf32>
    %107 = vector.broadcast %104 : vector<1x1xf32> to vector<2x16xf32>
    %108 = arith.mulf %107, %106 : vector<2x16xf32>
    %109 = arith.addf %103, %108 : vector<2x16xf32>
    %c0_51 = arith.constant 0 : index
    %c0_52 = arith.constant 0 : index
    %110 = vector.load %arg10[%c0_51, %c0_52] : memref<16x4xf32, #tpu.memory_space<vmem>>, vector<16x4xf32>
    %cst_53 = arith.constant dense<0.000000e+00> : vector<2x4xf32>
    %111 = tpu.matmul %109, %110, %cst_53 {dimension_numbers = #tpu.dot_dimension_numbers<[1], [0], [0], [1], [0, 0, 1, 1], [], []>} : vector<2x16xf32>, vector<16x4xf32>, vector<2x4xf32> -> vector<2x4xf32>
    %c0_54 = arith.constant 0 : index
    %c0_55 = arith.constant 0 : index
    %112 = vector.load %arg11[%c0_54, %c0_55] : memref<1x4xf32, #tpu.memory_space<vmem>>, vector<1x4xf32>
    %113 = vector.broadcast %112 : vector<1x4xf32> to vector<2x4xf32>
    %114 = arith.addf %111, %113 : vector<2x4xf32>
    %115 = arith.negf %114 : vector<2x4xf32>
    %116 = math.exp %115 : vector<2x4xf32>
    %cst_56 = arith.constant 1.000000e+00 : f32
    %117 = vector.broadcast %cst_56 : f32 to vector<2x4xf32>
    %118 = arith.addf %117, %116 : vector<2x4xf32>
    %119 = arith.divf %117, %118 : vector<2x4xf32>
    %120 = vector.broadcast %87 : vector<1x4xf32> to vector<2x4xf32>
    %121 = arith.mulf %119, %120 : vector<2x4xf32>
    %122 = vector.broadcast %90 : vector<1x4xf32> to vector<2x4xf32>
    %123 = arith.mulf %119, %122 : vector<2x4xf32>
    %124 = tpu.concatenate %121, %123 in 0 : vector<2x4xf32>, vector<2x4xf32> -> vector<4x4xf32>
    %cst_57 = arith.constant dense<0.000000e+00> : vector<4x128xf32>
    %125 = tpu.matmul %124, %0, %cst_57 {dimension_numbers = #tpu.dot_dimension_numbers<[1], [0], [0], [1], [0, 0, 1, 1], [], []>} : vector<4x4xf32>, vector<4x128xf32>, vector<4x128xf32> -> vector<4x128xf32>
    %126 = vector.extract_strided_slice %125 {offsets = [0, 0], sizes = [2, 128], strides = [1, 1]} : vector<4x128xf32> to vector<2x128xf32>
    %127 = vector.shape_cast %126 : vector<2x128xf32> to vector<2x1x128xf32>
    %128 = vector.extract_strided_slice %125 {offsets = [2, 0], sizes = [2, 128], strides = [1, 1]} : vector<4x128xf32> to vector<2x128xf32>
    %129 = vector.shape_cast %128 : vector<2x128xf32> to vector<2x1x128xf32>
    %130 = vector.shape_cast %64 : vector<16x128xf32> to vector<2x8x128xf32>
    %131 = vector.broadcast %127 : vector<2x1x128xf32> to vector<2x8x128xf32>
    %132 = arith.mulf %130, %131 : vector<2x8x128xf32>
    %133 = vector.broadcast %129 : vector<2x1x128xf32> to vector<2x8x128xf32>
    %134 = arith.addf %132, %133 : vector<2x8x128xf32>
    %135 = arith.addf %134, %3 : vector<2x8x128xf32>
    %cst_58 = arith.constant 0.000000e+00 : f32
    %136 = vector.broadcast %cst_58 : f32 to vector<2x8x128xf32>
    %137 = arith.maximumf %135, %136 : vector<2x8x128xf32>
    %c0_59 = arith.constant 0 : index
    %c0_60 = arith.constant 0 : index
    %c0_61 = arith.constant 0 : index
    %138 = vector.load %arg15[%c0_59, %c0_60, %c0_61] : memref<2x8x128xf32, #tpu.memory_space<vmem>>, vector<2x8x128xf32>
    tpu.vector_store %arg15[%c0_59, %c0_60, %c0_61], %137 {strides = array<i32>} : memref<2x8x128xf32, #tpu.memory_space<vmem>>, vector<2x8x128xf32>,
    return
  }
}

</mosaic_0001>

<bundles_post_ra>
// kernel: tile.9
= control target key start
LH: loop header
LB: loop body
LE: loop exit
PB: predicated region body
PF: predicated region fallthrough
CT: control target
= control target key end

     0   :  { %vm5_vm0 = vcmask 1041409   ;;  %vm9_vm1 = vcmask 1042434   ;;  %vm13_vm2 = vcmask 1043459   ;;  %s741_s30 = smov 124   ;;  %s742_s8 = smov 116   ;;  %vm15_vm3 = vcmask 31744   ;;  %s1266_s0 = inlined_call_operand.vmem [shape: f32[32,4,4], index: 0, kind: input, shape index: {}]   ;;  %s1267_s1 = inlined_call_operand.vmem [shape: f32[128,4], index: 1, kind: output, shape index: {}]  }
   0x1   :  { %v586_v0 = vld [vmem:[%s1266_s0 + $0x1f] sm:$0x1]   ;;  %v594_v5 = vld [vmem:[%s1266_s0 + $0x1d] sm:$0x1]   ;;  %v590_v11 = vld [vmem:[%s1266_s0 + $0x1e] sm:$0x1]  }
   0x2   :  { %v587_v1 = vld [vmem:[%s1266_s0 + $0x3e] sm:$0x2]   ;;  %v595_v6 = vld [vmem:[%s1266_s0 + $0x3c] sm:$0x2]   ;;  %v591_v14 = vld [vmem:[%s1266_s0 + $0x3d] sm:$0x2]  }
   0x3   :  { %v588_v2 = vld [vmem:[%s1266_s0 + $0x5d] sm:$0x4]   ;;  %v22_v4 = vsel %vm5_vm0, %v587_v1, %v586_v0  ;;  %v596_v7 = vld [vmem:[%s1266_s0 + $0x5b] sm:$0x4]   ;;  %v58_v9 = vsel %vm5_vm0, %v595_v6, %v594_v5  ;;  %v592_v15 = vld [vmem:[%s1266_s0 + $0x5c] sm:$0x4]   ;;  %v40_v18 = vsel %vm5_vm0, %v591_v14, %v590_v11 }
   0x4   :  { %v589_v3 = vld [vmem:[%s1266_s0 + $0x7c] sm:$0x8]   ;;  %v26_v8 = vsel %vm9_vm1, %v588_v2, %v22_v4  ;;  %v597_v10 = vld [vmem:[%s1266_s0 + $0x7a] sm:$0x8]   ;;  %v62_v13 = vsel %vm9_vm1, %v596_v7, %v58_v9  ;;  %v593_v16 = vld [vmem:[%s1266_s0 + $0x7b] sm:$0x8]   ;;  %v44_v22 = vsel %vm9_vm1, %v592_v15, %v40_v18 }
   0x5   :  { %v30_v12 = vsel %vm13_vm2, %v589_v3, %v26_v8  ;;  %v66_v17 = vsel %vm13_vm2, %v597_v10, %v62_v13  ;;  %v598_v19 = vld [vmem:[%s1266_s0 + $0x1c] sm:$0x1]   ;;  %v602_v25 = vld [vmem:[%s1266_s0 + $0x1b] sm:$0x1]   ;;  %v48_v26 = vsel %vm13_vm2, %v593_v16, %v44_v22  ;;  %v606_v33 = vld [vmem:[%s1266_s0 + $0x1a] sm:$0x1]  }
   0x6   :  { %31 = vrot.lane.b32.xlu0 %v30_v12, %s741_s30  ;;  %v599_v20 = vld [vmem:[%s1266_s0 + $0x3b] sm:$0x2]   ;;  %67 = vrot.lane.b32.xlu1 %v66_v17, %s742_s8  ;;  %v603_v28 = vld [vmem:[%s1266_s0 + $0x3a] sm:$0x2]   ;;  %s743_s25 = smov 120   ;;  %s744_s30 = smov 112  }
   0x7   :  { %v600_v21 = vld [vmem:[%s1266_s0 + $0x5a] sm:$0x4]   ;;  %v76_v23 = vsel %vm5_vm0, %v599_v20, %v598_v19  ;;  %v604_v29 = vld [vmem:[%s1266_s0 + $0x59] sm:$0x4]   ;;  %v94_v32 = vsel %vm5_vm0, %v603_v28, %v602_v25  ;;  %v607_v34 = vld [vmem:[%s1266_s0 + $0x39] sm:$0x2]  }
   0x8   :  { %v601_v24 = vld [vmem:[%s1266_s0 + $0x79] sm:$0x8]   ;;  %v80_v27 = vsel %vm9_vm1, %v600_v21, %v76_v23  ;;  %v605_v30 = vld [vmem:[%s1266_s0 + $0x78] sm:$0x8]   ;;  %v608_v35 = vld [vmem:[%s1266_s0 + $0x58] sm:$0x4]   ;;  %v98_v36 = vsel %vm9_vm1, %v604_v29, %v94_v32  ;;  %v112_v37 = vsel %vm5_vm0, %v607_v34, %v606_v33 }
   0x9   :  { %v84_v31 = vsel %vm13_vm2, %v601_v24, %v80_v27  ;;  %v609_v38 = vld [vmem:[%s1266_s0 + $0x77] sm:$0x8]   ;;  %v610_v39 = vld [vmem:[%s1266_s0 + $0x19] sm:$0x1]   ;;  %v102_v40 = vsel %vm13_vm2, %v605_v30, %v98_v36  ;;  %v116_v41 = vsel %vm9_vm1, %v608_v35, %v112_v37  ;;  %v614_v47 = vld [vmem:[%s1266_s0 + $0x18] sm:$0x1]  }
   0xa   :  { %49 = vrot.lane.b32.xlu0 %v48_v26, %s743_s25  ;;  %85 = vrot.lane.b32.xlu1 %v84_v31, %s744_s30  ;;  %v611_v42 = vld [vmem:[%s1266_s0 + $0x38] sm:$0x2]   ;;  %v120_v45 = vsel %vm13_vm2, %v609_v38, %v116_v41  ;;  %v615_v48 = vld [vmem:[%s1266_s0 + $0x37] sm:$0x2]   ;;  %s745_s18 = smov 108   ;;  %s746_s23 = smov 104  }
   0xb   :  { %v612_v43 = vld [vmem:[%s1266_s0 + $0x57] sm:$0x4]   ;;  %v130_v46 = vsel %vm5_vm0, %v611_v42, %v610_v39  ;;  %v616_v49 = vld [vmem:[%s1266_s0 + $0x56] sm:$0x4]   ;;  %v148_v51 = vsel %vm5_vm0, %v615_v48, %v614_v47  ;;  %v618_v53 = vld [vmem:[%s1266_s0 + $0x17] sm:$0x1]  }
   0xc   :  { %v613_v44 = vld [vmem:[%s1266_s0 + $0x76] sm:$0x8]   ;;  %v134_v50 = vsel %vm9_vm1, %v612_v43, %v130_v46  ;;  %v617_v52 = vld [vmem:[%s1266_s0 + $0x75] sm:$0x8]   ;;  %v152_v54 = vsel %vm9_vm1, %v616_v49, %v148_v51  ;;  %v619_v55 = vld [vmem:[%s1266_s0 + $0x36] sm:$0x2]  }
   0xd   :  { %v620_v56 = vld [vmem:[%s1266_s0 + $0x55] sm:$0x4]   ;;  %v138_v57 = vsel %vm13_vm2, %v613_v44, %v134_v50  ;;  %v166_v58 = vsel %vm5_vm0, %v619_v55, %v618_v53  ;;  %v622_v59 = vld [vmem:[%s1266_s0 + $0x16] sm:$0x1]   ;;  %v156_v62 = vsel %vm13_vm2, %v617_v52, %v152_v54  ;;  %v626_v2 = vld [vmem:[%s1266_s0 + $0x15] sm:$0x1]  }
   0xe   :  { %103 = vrot.lane.b32.xlu0 %v102_v40, %s745_s18  ;;  %121 = vrot.lane.b32.xlu1 %v120_v45, %s746_s23  ;;  %v623_v60 = vld [vmem:[%s1266_s0 + $0x35] sm:$0x2]   ;;  %v170_v63 = vsel %vm9_vm1, %v620_v56, %v166_v58  ;;  %v621_v0 = vld [vmem:[%s1266_s0 + $0x74] sm:$0x8]   ;;  %s747_s11 = smov 100   ;;  %s748_s18 = smov 96  }
   0xf   :  { %v624_v61 = vld [vmem:[%s1266_s0 + $0x54] sm:$0x4]   ;;  %v184_v1 = vsel %vm5_vm0, %v623_v60, %v622_v59  ;;  %v627_v5 = vld [vmem:[%s1266_s0 + $0x34] sm:$0x2]   ;;  %v630_v8 = vld [vmem:[%s1266_s0 + $0x14] sm:$0x1]   ;;  %v174_v11 = vsel %vm13_vm2, %v621_v0, %v170_v63 }
  0x10   :  { %v188_v3 = vsel %vm9_vm1, %v624_v61, %v184_v1  ;;  %v625_v4 = vld [vmem:[%s1266_s0 + $0x73] sm:$0x8]   ;;  %v628_v6 = vld [vmem:[%s1266_s0 + $0x53] sm:$0x4]   ;;  %v202_v7 = vsel %vm5_vm0, %v627_v5, %v626_v2  ;;  %v631_v9 = vld [vmem:[%s1266_s0 + $0x33] sm:$0x2]  }
  0x11   :  { %v632_v10 = vld [vmem:[%s1266_s0 + $0x52] sm:$0x4]   ;;  %v220_v12 = vsel %vm5_vm0, %v631_v9, %v630_v8  ;;  %v634_v13 = vld [vmem:[%s1266_s0 + $0x13] sm:$0x1]   ;;  %v192_v14 = vsel %vm13_vm2, %v625_v4, %v188_v3  ;;  %v206_v15 = vsel %vm9_vm1, %v628_v6, %v202_v7  ;;  %v629_v16 = vld [vmem:[%s1266_s0 + $0x72] sm:$0x8]  }
  0x12   :  { %139 = vrot.lane.b32.xlu0 %v138_v57, %s747_s11  ;;  %157 = vrot.lane.b32.xlu1 %v156_v62, %s748_s18  ;;  %v633_v17 = vld [vmem:[%s1266_s0 + $0x71] sm:$0x8]   ;;  %v635_v18 = vld [vmem:[%s1266_s0 + $0x32] sm:$0x2]   ;;  %v224_v19 = vsel %vm9_vm1, %v632_v10, %v220_v12  ;;  %s749_s4 = smov 92   ;;  %s750_s9 = smov 88   ;;  %v210_v27 = vsel %vm13_vm2, %v629_v16, %v206_v15 }
  0x13   :  { %v238_v20 = vsel %vm5_vm0, %v635_v18, %v634_v13  ;;  %v636_v21 = vld [vmem:[%s1266_s0 + $0x51] sm:$0x4]   ;;  %v638_v22 = vld [vmem:[%s1266_s0 + $0x12] sm:$0x1]   ;;  %v642_v26 = vld [vmem:[%s1266_s0 + $0x11] sm:$0x1]   ;;  %v228_v29 = vsel %vm13_vm2, %v633_v17, %v224_v19 }
  0x14   :  { %v639_v23 = vld [vmem:[%s1266_s0 + $0x31] sm:$0x2]   ;;  %v643_v28 = vld [vmem:[%s1266_s0 + $0x30] sm:$0x2]   ;;  %v242_v30 = vsel %vm9_vm1, %v636_v21, %v238_v20  ;;  %v637_v31 = vld [vmem:[%s1266_s0 + $0x70] sm:$0x8]  }
  0x15   :  { %v256_v24 = vsel %vm5_vm0, %v639_v23, %v638_v22  ;;  %v640_v25 = vld [vmem:[%s1266_s0 + $0x50] sm:$0x4]   ;;  %v646_v32 = vld [vmem:[%s1266_s0 + $0x10] sm:$0x1]   ;;  %v274_v36 = vsel %vm5_vm0, %v643_v28, %v642_v26  ;;  %v644_v37 = vld [vmem:[%s1266_s0 + $0x4f] sm:$0x4]   ;;  %v246_v42 = vsel %vm13_vm2, %v637_v31, %v242_v30 }
  0x16   :  { %175 = vrot.lane.b32.xlu0 %v174_v11, %s749_s4  ;;  %193 = vrot.lane.b32.xlu1 %v192_v14, %s750_s9  ;;  %v647_v33 = vld [vmem:[%s1266_s0 + $0x2f] sm:$0x2]   ;;  %v260_v34 = vsel %vm9_vm1, %v640_v25, %v256_v24  ;;  %v641_v35 = vld [vmem:[%s1266_s0 + $0x6f] sm:$0x8]   ;;  %s751_s22 = smov 84   ;;  %s752_s29 = smov 80   ;;  %v278_v46 = vsel %vm9_vm1, %v644_v37, %v274_v36 }
  0x17   :  { %v292_v38 = vsel %vm5_vm0, %v647_v33, %v646_v32  ;;  %v648_v39 = vld [vmem:[%s1266_s0 + $0x4e] sm:$0x4]   ;;  %v650_v40 = vld [vmem:[%s1266_s0 + $0xf] sm:$0x1]   ;;  %v654_v43 = vld [vmem:[%s1266_s0 + $0xe] sm:$0x1]   ;;  %v264_v45 = vsel %vm13_vm2, %v641_v35, %v260_v34 }
  0x18   :  { %v651_v41 = vld [vmem:[%s1266_s0 + $0x2e] sm:$0x2]   ;;  %v655_v44 = vld [vmem:[%s1266_s0 + $0x2d] sm:$0x2]   ;;  %v645_v47 = vld [vmem:[%s1266_s0 + $0x6e] sm:$0x8]   ;;  %v296_v48 = vsel %vm9_vm1, %v648_v39, %v292_v38 }
  0x19   :  { %v649_v49 = vld [vmem:[%s1266_s0 + $0x6d] sm:$0x8]   ;;  %v310_v50 = vsel %vm5_vm0, %v651_v41, %v650_v40  ;;  %v652_v51 = vld [vmem:[%s1266_s0 + $0x4d] sm:$0x4]   ;;  %s753_s11 = smov 76   ;;  %v328_v52 = vsel %vm5_vm0, %v655_v44, %v654_v43  ;;  %s754_s18 = smov 72   ;;  %v282_v56 = vsel %vm13_vm2, %v645_v47, %v278_v46 }
  0x1a   :  { %211 = vrot.lane.b32.xlu0 %v210_v27, %s751_s22  ;;  %229 = vrot.lane.b32.xlu1 %v228_v29, %s752_s29  ;;  %v656_v53 = vld [vmem:[%s1266_s0 + $0x4c] sm:$0x4]   ;;  %v658_v54 = vld [vmem:[%s1266_s0 + $0xd] sm:$0x1]   ;;  %v300_v59 = vsel %vm13_vm2, %v649_v49, %v296_v48  ;;  %v314_v60 = vsel %vm9_vm1, %v652_v51, %v310_v50  ;;  %s755_s29 = smov 68   ;;  %s756_s7 = smov 64  }
  0x1b   :  { %v659_v55 = vld [vmem:[%s1266_s0 + $0x2c] sm:$0x2]   ;;  %v662_v57 = vld [vmem:[%s1266_s0 + $0xc] sm:$0x1]   ;;  %v653_v61 = vld [vmem:[%s1266_s0 + $0x6c] sm:$0x8]   ;;  %v332_v62 = vsel %vm9_vm1, %v656_v53, %v328_v52 }
  0x1c   :  { %v663_v58 = vld [vmem:[%s1266_s0 + $0x2b] sm:$0x2]   ;;  %v657_v63 = vld [vmem:[%s1266_s0 + $0x6b] sm:$0x8]   ;;  %v346_v0 = vsel %vm5_vm0, %v659_v55, %v658_v54  ;;  %v660_v1 = vld [vmem:[%s1266_s0 + $0x4b] sm:$0x4]   ;;  %v318_v6 = vsel %vm13_vm2, %v653_v61, %v314_v60 }
  0x1d   :  { %v364_v2 = vsel %vm5_vm0, %v663_v58, %v662_v57  ;;  %v664_v3 = vld [vmem:[%s1266_s0 + $0x4a] sm:$0x4]   ;;  %v666_v4 = vld [vmem:[%s1266_s0 + $0xb] sm:$0x1]   ;;  %v670_v7 = vld [vmem:[%s1266_s0 + $0xa] sm:$0x1]   ;;  %v336_v9 = vsel %vm13_vm2, %v657_v63, %v332_v62  ;;  %v350_v10 = vsel %vm9_vm1, %v660_v1, %v346_v0 }
  0x1e   :  { %247 = vrot.lane.b32.xlu0 %v246_v42, %s753_s11  ;;  %265 = vrot.lane.b32.xlu1 %v264_v45, %s754_s18  ;;  %v667_v5 = vld [vmem:[%s1266_s0 + $0x2a] sm:$0x2]   ;;  %v671_v8 = vld [vmem:[%s1266_s0 + $0x29] sm:$0x2]   ;;  %v368_v12 = vsel %vm9_vm1, %v664_v3, %v364_v2  ;;  %s757_s18 = smov 60   ;;  %s758_s25 = smov 56  }
  0x1f   :  { %v661_v11 = vld [vmem:[%s1266_s0 + $0x6a] sm:$0x8]   ;;  %v665_v13 = vld [vmem:[%s1266_s0 + $0x69] sm:$0x8]   ;;  %v382_v14 = vsel %vm5_vm0, %v667_v5, %v666_v4  ;;  %v668_v15 = vld [vmem:[%s1266_s0 + $0x49] sm:$0x4]   ;;  %v400_v16 = vsel %vm5_vm0, %v671_v8, %v670_v7 }
  0x20   :  { %v672_v17 = vld [vmem:[%s1266_s0 + $0x48] sm:$0x4]   ;;  %v674_v18 = vld [vmem:[%s1266_s0 + $0x9] sm:$0x1]   ;;  %v354_v20 = vsel %vm13_vm2, %v661_v11, %v350_v10  ;;  %v678_v21 = vld [vmem:[%s1266_s0 + $0x8] sm:$0x1]   ;;  %v372_v23 = vsel %vm13_vm2, %v665_v13, %v368_v12  ;;  %v386_v24 = vsel %vm9_vm1, %v668_v15, %v382_v14 }
  0x21   :  { %v675_v19 = vld [vmem:[%s1266_s0 + $0x28] sm:$0x2]   ;;  %v679_v22 = vld [vmem:[%s1266_s0 + $0x27] sm:$0x2]   ;;  %v669_v25 = vld [vmem:[%s1266_s0 + $0x68] sm:$0x8]   ;;  %v404_v26 = vsel %vm9_vm1, %v672_v17, %v400_v16 }
  0x22   :  { %283 = vrot.lane.b32.xlu0 %v282_v56, %s755_s29  ;;  %301 = vrot.lane.b32.xlu1 %v300_v59, %s756_s7  ;;  %v673_v27 = vld [vmem:[%s1266_s0 + $0x67] sm:$0x8]   ;;  %v418_v28 = vsel %vm5_vm0, %v675_v19, %v674_v18  ;;  %v676_v29 = vld [vmem:[%s1266_s0 + $0x47] sm:$0x4]   ;;  %s759_s7 = smov 52   ;;  %v436_v30 = vsel %vm5_vm0, %v679_v22, %v678_v21  ;;  %s760_s14 = smov 48   ;;  %v390_v34 = vsel %vm13_vm2, %v669_v25, %v386_v24 }
  0x23   :  { %v680_v31 = vld [vmem:[%s1266_s0 + $0x46] sm:$0x4]   ;;  %v682_v32 = vld [vmem:[%s1266_s0 + $0x7] sm:$0x1]   ;;  %v686_v35 = vld [vmem:[%s1266_s0 + $0x6] sm:$0x1]   ;;  %v408_v37 = vsel %vm13_vm2, %v673_v27, %v404_v26  ;;  %v422_v38 = vsel %vm9_vm1, %v676_v29, %v418_v28 }
  0x24   :  { %v683_v33 = vld [vmem:[%s1266_s0 + $0x26] sm:$0x2]   ;;  %v687_v36 = vld [vmem:[%s1266_s0 + $0x25] sm:$0x2]   ;;  %v677_v39 = vld [vmem:[%s1266_s0 + $0x66] sm:$0x8]   ;;  %v440_v40 = vsel %vm9_vm1, %v680_v31, %v436_v30 }
  0x25   :  { %v681_v41 = vld [vmem:[%s1266_s0 + $0x65] sm:$0x8]   ;;  %v454_v42 = vsel %vm5_vm0, %v683_v33, %v682_v32  ;;  %v684_v43 = vld [vmem:[%s1266_s0 + $0x45] sm:$0x4]   ;;  %v472_v45 = vsel %vm5_vm0, %v687_v36, %v686_v35  ;;  %v688_v46 = vld [vmem:[%s1266_s0 + $0x44] sm:$0x4]   ;;  %v426_v49 = vsel %vm13_vm2, %v677_v39, %v422_v38 }
  0x26   :  { %319 = vrot.lane.b32.xlu0 %v318_v6, %s757_s18  ;;  %337 = vrot.lane.b32.xlu1 %v336_v9, %s758_s25  ;;  %s761_s25 = smov 44   ;;  %v685_v44 = vld [vmem:[%s1266_s0 + $0x64] sm:$0x8]   ;;  %v690_v47 = vld [vmem:[%s1266_s0 + $0x5] sm:$0x1]   ;;  %s762_s5 = smov 40   ;;  %v444_v53 = vsel %vm13_vm2, %v681_v41, %v440_v40  ;;  %v458_v54 = vsel %vm9_vm1, %v684_v43, %v454_v42  ;;  %v476_v58 = vsel %vm9_vm1, %v688_v46, %v472_v45 }
  0x27   :  { %v691_v48 = vld [vmem:[%s1266_s0 + $0x24] sm:$0x2]   ;;  %v689_v50 = vld [vmem:[%s1266_s0 + $0x63] sm:$0x8]   ;;  %v694_v51 = vld [vmem:[%s1266_s0 + $0x4] sm:$0x1]   ;;  %v462_v3 = vsel %vm13_vm2, %v685_v44, %v458_v54 }
  0x28   :  { %v695_v52 = vld [vmem:[%s1266_s0 + $0x23] sm:$0x2]   ;;  %v692_v55 = vld [vmem:[%s1266_s0 + $0x43] sm:$0x4]   ;;  %v584_v57 = vld [vmem:[%s1266_s0 + $0x3e] sm:$0x4]   ;;  %v490_v59 = vsel %vm5_vm0, %v691_v48, %v690_v47  ;;  %v480_v7 = vsel %vm13_vm2, %v689_v50, %v476_v58 }
  0x29   :  { %v696_v56 = vld [vmem:[%s1266_s0 + $0x42] sm:$0x4]   ;;  %v585_v60 = vld [vmem:[%s1266_s0 + $0x5d] sm:$0x8]   ;;  %s763_s24 = smov 36   ;;  %v508_v63 = vsel %vm5_vm0, %v695_v52, %v694_v51  ;;  %s764_s29 = smov 32   ;;  %v494_v8 = vsel %vm9_vm1, %v692_v55, %v490_v59 }
  0x2a   :  { %355 = vrot.lane.b32.xlu0 %v354_v20, %s759_s7  ;;  %373 = vrot.lane.b32.xlu1 %v372_v23, %s760_s14  ;;  %v2_v61 = vld [vmem:[%s1266_s0] sm:$0x1]   ;;  %v698_v0 = vld [vmem:[%s1266_s0 + $0x3] sm:$0x1]   ;;  %v512_v11 = vsel %vm9_vm1, %v696_v56, %v508_v63  ;;  %s765_s11 = smov 28   ;;  %s766_s18 = smov 24  }
  0x2b   :  { %v583_v62 = vld [vmem:[%s1266_s0 + $0x1f] sm:$0x2]   ;;  %v699_v1 = vld [vmem:[%s1266_s0 + $0x22] sm:$0x2]   ;;  %v702_v4 = vld [vmem:[%s1266_s0 + $0x2] sm:$0x1]  }
  0x2c   :  { %v6_v2 = vsel %vm5_vm0, %v583_v62, %v2_v61  ;;  %v703_v5 = vld [vmem:[%s1266_s0 + $0x21] sm:$0x2]   ;;  %v693_v9 = vld [vmem:[%s1266_s0 + $0x62] sm:$0x8]   ;;  %v697_v12 = vld [vmem:[%s1266_s0 + $0x61] sm:$0x8]   ;;  %v526_v13 = vsel %vm5_vm0, %v699_v1, %v698_v0 }
  0x2d   :  { %v10_v6 = vsel %vm9_vm1, %v584_v57, %v6_v2  ;;  %v700_v14 = vld [vmem:[%s1266_s0 + $0x41] sm:$0x4]   ;;  %v544_v15 = vsel %vm5_vm0, %v703_v5, %v702_v4  ;;  %v704_v16 = vld [vmem:[%s1266_s0 + $0x40] sm:$0x4]   ;;  %v706_v17 = vld [vmem:[%s1266_s0 + $0x1] sm:$0x1]   ;;  %v498_v19 = vsel %vm13_vm2, %v693_v9, %v494_v8  ;;  %v516_v20 = vsel %vm13_vm2, %v697_v12, %v512_v11 }
  0x2e   :  { %391 = vrot.lane.b32.xlu0 %v390_v34, %s761_s25  ;;  %409 = vrot.lane.b32.xlu1 %v408_v37, %s762_s5  ;;  %v14_v10 = vsel %vm13_vm2, %v585_v60, %v10_v6  ;;  %v707_v18 = vld [vmem:[%s1266_s0 + $0x20] sm:$0x2]   ;;  %v530_v21 = vsel %vm9_vm1, %v700_v14, %v526_v13  ;;  %v701_v22 = vld [vmem:[%s1266_s0 + $0x60] sm:$0x8]   ;;  %v548_v23 = vsel %vm9_vm1, %v704_v16, %v544_v15  ;;  %s767_s25 = smov 20   ;;  %s768_s26 = smov 16  }
  0x2f   :  { %16 = vst.msk [vmem:[#allocation0] sm:$0xf] %vm15_vm3, %v14_v10   ;;  %v705_v24 = vld [vmem:[%s1266_s0 + $0x5f] sm:$0x8]   ;;  %v562_v25 = vsel %vm5_vm0, %v707_v18, %v706_v17  ;;  %v708_v26 = vld [vmem:[%s1266_s0 + $0x3f] sm:$0x4]   ;;  %v534_v27 = vsel %vm13_vm2, %v701_v22, %v530_v21 }
  0x30   :  { %v552_v28 = vsel %vm13_vm2, %v705_v24, %v548_v23  ;;  %v566_v29 = vsel %vm9_vm1, %v708_v26, %v562_v25  ;;  %v709_v30 = vld [vmem:[%s1266_s0 + $0x5e] sm:$0x8]   ;;  %s769_s0 = smov 12   ;;  %s771_s30 = smov 4   ;;  %vm33_vm4 = vcmask 1048544   ;;  %vm51_vm5 = vcmask 1015744  }
  0x31   :  { %v570_v31 = vsel %vm13_vm2, %v709_v30, %v566_v29  ;;  %vm69_vm6 = vcmask 982944   ;;  %vm87_vm7 = vcmask 950144   ;;  %vm105_vm8 = vcmask 917344  }
  0x32   :  { %427 = vrot.lane.b32.xlu0 %v426_v49, %s763_s24  ;;  %445 = vrot.lane.b32.xlu1 %v444_v53, %s764_s29  ;;  %s770_s29 = smov 8   ;;  %vm123_vm9 = vcmask 884544   ;;  %vm141_vm10 = vcmask 851744   ;;  %vm159_vm11 = vcmask 818944   ;;  %vm177_vm12 = vcmask 786144  }
  0x33   :  { %vm195_vm13 = vcmask 753344   ;;  %vm213_vm14 = vcmask 720544   ;;  %vm231_vm15 = vcmask 687744   ;;  %vm249_vm0 = vcmask 654944  }
  0x34   :  { %vm267_vm1 = vcmask 622144   ;;  %vm285_vm2 = vcmask 589344   ;;  %vm303_vm3 = vcmask 556544  }
  0x36   :  { %463 = vrot.lane.b32.xlu0 %v462_v3, %s765_s11  ;;  %481 = vrot.lane.b32.xlu1 %v480_v7, %s766_s18 }
  0x3a   :  { %499 = vrot.lane.b32.xlu0 %v498_v19, %s767_s25  ;;  %517 = vrot.lane.b32.xlu1 %v516_v20, %s768_s26 }
  0x3e   :  { %535 = vrot.lane.b32.xlu0 %v534_v27, %s769_s0  ;;  %553 = vrot.lane.b32.xlu1 %v552_v28, %s770_s29 }
  0x42   :  { %571 = vrot.lane.b32.xlu0 %v570_v31, %s771_s30 }
  0x78   :  { %v32_v32 = vpop.permute.xlu0 %31   ;;  %v68_v33 = vpop.permute.xlu1 %67  }
  0x79   :  { %34 = vst.msk [vmem:[#allocation0] sm:$0xf] %vm33_vm4, %v32_v32   ;;  %vm321_vm4 = vcmask 523744  }
  0x7c   :  { %v50_v34 = vpop.permute.xlu0 %49   ;;  %v86_v35 = vpop.permute.xlu1 %85  }
  0x7d   :  { %52 = vst.msk [vmem:[#allocation0] sm:$0xf] %vm51_vm5, %v50_v34   ;;  %vm339_vm5 = vcmask 490944  }
  0x7e   :  { %70 = vst.msk [vmem:[#allocation0] sm:$0xf] %vm69_vm6, %v68_v33   ;;  %vm357_vm6 = vcmask 458144  }
  0x7f   :  { %88 = vst.msk [vmem:[#allocation0] sm:$0xf] %vm87_vm7, %v86_v35   ;;  %vm375_vm7 = vcmask 425344  }
  0x80   :  { %v104_v36 = vpop.permute.xlu0 %103   ;;  %v122_v37 = vpop.permute.xlu1 %121  }
  0x81   :  { %106 = vst.msk [vmem:[#allocation0] sm:$0xf] %vm105_vm8, %v104_v36   ;;  %vm393_vm8 = vcmask 392544  }
  0x82   :  { %124 = vst.msk [vmem:[#allocation0] sm:$0xf] %vm123_vm9, %v122_v37   ;;  %vm411_vm9 = vcmask 359744  }
  0x84   :  { %v140_v38 = vpop.permute.xlu0 %139   ;;  %v158_v39 = vpop.permute.xlu1 %157  }
  0x85   :  { %142 = vst.msk [vmem:[#allocation0] sm:$0xf] %vm141_vm10, %v140_v38   ;;  %vm429_vm10 = vcmask 326944  }
  0x86   :  { %160 = vst.msk [vmem:[#allocation0] sm:$0xf] %vm159_vm11, %v158_v39   ;;  %vm447_vm11 = vcmask 294144  }
  0x88   :  { %v176_v40 = vpop.permute.xlu0 %175   ;;  %v194_v41 = vpop.permute.xlu1 %193  }
  0x89   :  { %178 = vst.msk [vmem:[#allocation0] sm:$0xf] %vm177_vm12, %v176_v40   ;;  %vm465_vm12 = vcmask 261344  }
  0x8a   :  { %196 = vst.msk [vmem:[#allocation0] sm:$0xf] %vm195_vm13, %v194_v41   ;;  %vm483_vm13 = vcmask 228544  }
  0x8c   :  { %v212_v42 = vpop.permute.xlu0 %211   ;;  %v230_v43 = vpop.permute.xlu1 %229  }
  0x8d   :  { %214 = vst.msk [vmem:[#allocation0] sm:$0xf] %vm213_vm14, %v212_v42   ;;  %vm501_vm14 = vcmask 195744  }
  0x8e   :  { %232 = vst.msk [vmem:[#allocation0] sm:$0xf] %vm231_vm15, %v230_v43   ;;  %vm519_vm15 = vcmask 162944  }
  0x90   :  { %v248_v44 = vpop.permute.xlu0 %247   ;;  %v266_v45 = vpop.permute.xlu1 %265  }
  0x91   :  { %250 = vst.msk [vmem:[#allocation0] sm:$0xf] %vm249_vm0, %v248_v44   ;;  %vm537_vm0 = vcmask 130144  }
  0x92   :  { %268 = vst.msk [vmem:[#allocation0] sm:$0xf] %vm267_vm1, %v266_v45   ;;  %vm555_vm1 = vcmask 97344  }
  0x94   :  { %v284_v46 = vpop.permute.xlu0 %283   ;;  %v302_v47 = vpop.permute.xlu1 %301  }
  0x95   :  { %286 = vst.msk [vmem:[#allocation0] sm:$0xf] %vm285_vm2, %v284_v46   ;;  %vm573_vm2 = vcmask 64544  }
  0x96   :  { %304 = vst.msk [vmem:[#allocation0] sm:$0xf] %vm303_vm3, %v302_v47  }
  0x98   :  { %v320_v48 = vpop.permute.xlu0 %319   ;;  %v338_v49 = vpop.permute.xlu1 %337  }
  0x99   :  { %322 = vst.msk [vmem:[#allocation0] sm:$0xf] %vm321_vm4, %v320_v48  }
  0x9a   :  { %340 = vst.msk [vmem:[#allocation0] sm:$0xf] %vm339_vm5, %v338_v49  }
  0x9c   :  { %v356_v50 = vpop.permute.xlu0 %355   ;;  %v374_v51 = vpop.permute.xlu1 %373  }
  0x9d   :  { %358 = vst.msk [vmem:[#allocation0] sm:$0xf] %vm357_vm6, %v356_v50  }
  0x9e   :  { %376 = vst.msk [vmem:[#allocation0] sm:$0xf] %vm375_vm7, %v374_v51  }
  0xa0   :  { %v392_v52 = vpop.permute.xlu0 %391   ;;  %v410_v53 = vpop.permute.xlu1 %409  }
  0xa1   :  { %394 = vst.msk [vmem:[#allocation0] sm:$0xf] %vm393_vm8, %v392_v52  }
  0xa2   :  { %412 = vst.msk [vmem:[#allocation0] sm:$0xf] %vm411_vm9, %v410_v53  }
  0xa4   :  { %v428_v54 = vpop.permute.xlu0 %427   ;;  %v446_v55 = vpop.permute.xlu1 %445  }
  0xa5   :  { %430 = vst.msk [vmem:[#allocation0] sm:$0xf] %vm429_vm10, %v428_v54  }
  0xa6   :  { %448 = vst.msk [vmem:[#allocation0] sm:$0xf] %vm447_vm11, %v446_v55  }
  0xa8   :  { %v464_v56 = vpop.permute.xlu0 %463   ;;  %v482_v57 = vpop.permute.xlu1 %481  }
  0xa9   :  { %466 = vst.msk [vmem:[#allocation0] sm:$0xf] %vm465_vm12, %v464_v56  }
  0xaa   :  { %484 = vst.msk [vmem:[#allocation0] sm:$0xf] %vm483_vm13, %v482_v57  }
  0xac   :  { %v500_v58 = vpop.permute.xlu0 %499   ;;  %v518_v59 = vpop.permute.xlu1 %517  }
  0xad   :  { %502 = vst.msk [vmem:[#allocation0] sm:$0xf] %vm501_vm14, %v500_v58  }
  0xae   :  { %520 = vst.msk [vmem:[#allocation0] sm:$0xf] %vm519_vm15, %v518_v59  }
  0xb0   :  { %v536_v60 = vpop.permute.xlu0 %535   ;;  %v554_v61 = vpop.permute.xlu1 %553  }
  0xb1   :  { %538 = vst.msk [vmem:[#allocation0] sm:$0xf] %vm537_vm0, %v536_v60  }
  0xb2   :  { %556 = vst.msk [vmem:[#allocation0] sm:$0xf] %vm555_vm1, %v554_v61  }
  0xb4   :  { %v572_v62 = vpop.permute.xlu0 %571  }
  0xb5   :  { %574 = vst.msk [vmem:[#allocation0] sm:$0xf] %vm573_vm2, %v572_v62  }
  0xbc   :  { %v579_v63 = vld [vmem:[#allocation0] sm:$0xf] }
  0xbd   :  { %582 = vst [vmem:[%s1267_s1] sm:$0xf] %v579_v63 }

// kernel: se_basic_block.1
= control target key start
LH: loop header
LB: loop body
LE: loop exit
PB: predicated region body
PF: predicated region fallthrough
CT: control target
= control target key end

     0   :  { %vm106_vm0 = vcmask 1046528   ;;  %s1603_s28 = smov 64   ;;  %vm99_vm1 = vcmask 1040384   ;;  %vm123_vm2 = vcmask 523264   ;;  %v1604_v44 = vmov 0.0   ;;  %s1608_s30 = smov 124   ;;  %s2170_s0 = inlined_call_operand.vmem [shape: f32[2,8,128], index: 0, kind: input, shape index: {}]   ;;  %s2171_s1 = inlined_call_operand.vmem [shape: bf16[256,128], index: 1, kind: input, shape index: {}]   ;;  %s2172_s14 = inlined_call_operand.vmem [shape: f32[2,16], index: 14, kind: input, shape index: {}]   ;;  %s2173_s13 = inlined_call_operand.vmem [shape: f32[256,8], index: 13, kind: input, shape index: {}]   ;;  %s2174_s12 = inlined_call_operand.vmem [shape: f32[4,128], index: 12, kind: input, shape index: {}]   ;;  %s2175_s2 = inlined_call_operand.vmem [shape: f32[1,4], index: 2, kind: input, shape index: {}]   ;;  %s2176_s3 = inlined_call_operand.vmem [shape: f32[1,4], index: 3, kind: input, shape index: {}]   ;;  %s2177_s4 = inlined_call_operand.vmem [shape: bf16[256,128], index: 4, kind: input, shape index: {}]   ;;  %s2178_s7 = inlined_call_operand.vmem [shape: f32[4,16], index: 7, kind: input, shape index: {}]   ;;  %s2179_s9 = inlined_call_operand.<no memory space> [shape: f32[1,1], index: 9, kind: input, shape index: {}]   ;;  %s2180_s5 = inlined_call_operand.vmem [shape: f32[1,4], index: 5, kind: input, shape index: {}]   ;;  %s2181_s6 = inlined_call_operand.vmem [shape: f32[1,4], index: 6, kind: input, shape index: {}]   ;;  %s2182_s10 = inlined_call_operand.vmem [shape: f32[16,4], index: 10, kind: input, shape index: {}]   ;;  %s2183_s8 = inlined_call_operand.vmem [shape: f32[1,16], index: 8, kind: input, shape index: {}]   ;;  %s2184_s11 = inlined_call_operand.vmem [shape: f32[1,4], index: 11, kind: input, shape index: {}]   ;;  %s2185_s15 = inlined_call_operand.vmem [shape: f32[2,8,128], index: 15, kind: output, shape index: {}]  }
   0x1   :  { %v87_v0 = vld [vmem:[%s2170_s0] sm:$0xff]  ;;  %v88_v1 = vld [vmem:[%s2170_s0 + $0x8] sm:$0xff]  ;;  %v1561_v6 = vld [vmem:[%s2171_s1 + $0x78] sm:$0xff]   ;;  %369 = vmatprep.mubr.f32.mxu1 %v1604_v44  ;;  %vm301_vm3 = vcmask 130048   ;;  %vm446_vm4 = vcmask 25600   ;;  %vm455_vm5 = vcmask 58400  }
   0x2   :  { %v91_v2 = vrot.slane %v87_v0, 7  ;;  %v92_v3 = vrot.slane %v88_v1, 7  ;;  %v102_v4 = vrot.slane %v87_v0, 1  ;;  %v103_v5 = vrot.slane %v88_v1, 1  ;;  %v1562_v10 = vld [vmem:[%s2171_s1 + $0x38] sm:$0xff]   ;;  %v1563_v11 = vld [vmem:[%s2171_s1 + $0x70] sm:$0xff]   ;;  %1378 = vmatprep.subr.bf16.mxu0 %v1561_v6 }
   0x3   :  { %v1535_v13 = vpack.i.bf16 %v88_v1, %v87_v0  ;;  %1379 = vmatpush3.bf16.msra.mxu0 %v1562_v10  ;;  %v1564_v14 = vld [vmem:[%s2171_s1 + $0x30] sm:$0xff]   ;;  %v1565_v15 = vld [vmem:[%s2171_s1 + $0x68] sm:$0xff]   ;;  %v1567_v17 = vld [vmem:[%s2171_s1 + $0x60] sm:$0xff]   ;;  %vm507_vm6 = vcmask 1043456   ;;  %vm1607_vm7 = vmmov 0   ;;  %vm503_vm8 = vcmask 31744  }
   0x4   :  { %v1530_v7 = vpack.i.bf16 %v92_v3, %v91_v2  ;;  %v107_v8 = vsel %vm106_vm0, %v102_v4, 0.0  ;;  %v108_v9 = vsel %vm106_vm0, %v103_v5, 0.0  ;;  %1380 = vmatprep.subr.bf16.mxu0 %v1563_v11  ;;  %v1566_v16 = vld [vmem:[%s2171_s1 + $0x28] sm:$0xff]   ;;  %v1568_v18 = vld [vmem:[%s2171_s1 + $0x20] sm:$0xff]   ;;  %v1569_v19 = vld [vmem:[%s2171_s1 + $0x58] sm:$0xff]   ;;  %vm1199_vm9 = vcmask 1041408  }
   0x5   :  { %v1540_v12 = vpack.i.bf16 %v108_v9, %v107_v8  ;;  %v1570_v20 = vld [vmem:[%s2171_s1 + $0x18] sm:$0xff]   ;;  %v1571_v21 = vld [vmem:[%s2171_s1 + $0x50] sm:$0xff]   ;;  %v1573_v23 = vld [vmem:[%s2171_s1 + $0x48] sm:$0xff]  }
   0x6   :  { %1531 = vrot.lane.b32.xlu0 %v1530_v7, %s1603_s28  ;;  %v1572_v22 = vld [vmem:[%s2171_s1 + $0x10] sm:$0xff]   ;;  %v1574_v24 = vld [vmem:[%s2171_s1 + $0x8] sm:$0xff]   ;;  %v1575_v25 = vld [vmem:[%s2171_s1 + $0x40] sm:$0xff]  }
   0x7   :  { %1541 = vrot.lane.b32.xlu1 %v1540_v12, %s1603_s28  ;;  %1381 = vmatpush3.bf16.msra.mxu0 %v1564_v14  ;;  %v1576_v26 = vld [vmem:[%s2171_s1] sm:$0xff]   ;;  %v1774_v54 = vld [vmem:[%s2173_s13 + $0xf8] sm:$0xff]  ;;  %v1785_v56 = vld [vmem:[%s2173_s13 + $0xf0] sm:$0xff] }
   0x8   :  { %1382 = vmatprep.subr.bf16.mxu0 %v1565_v15  ;;  %v1769_v53 = vld [vmem:[%s2172_s14] sm:$0x3]  ;;  %v1779_v55 = vld [vmem:[%s2173_s13 + $0x78] sm:$0xff]  ;;  %v1793_v57 = vld [vmem:[%s2173_s13 + $0x70] sm:$0xff] }
   0x9   :  { %v1799_v58 = vld [vmem:[%s2173_s13 + $0xe8] sm:$0xff]  ;;  %v1811_v60 = vld [vmem:[%s2173_s13 + $0xe0] sm:$0xff]  ;;  %v1823_v62 = vld [vmem:[%s2173_s13 + $0xd8] sm:$0xff] }
   0xa   :  { %1536 = vrot.lane.b32.xlu0 %v1535_v13, %s1603_s28  ;;  %v1805_v59 = vld [vmem:[%s2173_s13 + $0x68] sm:$0xff]  ;;  %v1817_v61 = vld [vmem:[%s2173_s13 + $0x60] sm:$0xff]  ;;  %v1829_v63 = vld [vmem:[%s2173_s13 + $0x58] sm:$0xff] }
   0xb   :  { %1383 = vmatpush3.bf16.msra.mxu0 %v1566_v16  ;;  %v1835_v0 = vld [vmem:[%s2173_s13 + $0xd0] sm:$0xff]  ;;  %v1847_v2 = vld [vmem:[%s2173_s13 + $0xc8] sm:$0xff]  ;;  %v1859_v4 = vld [vmem:[%s2173_s13 + $0xc0] sm:$0xff] }
   0xc   :  { %1384 = vmatprep.subr.bf16.mxu0 %v1567_v17  ;;  %v1841_v1 = vld [vmem:[%s2173_s13 + $0x50] sm:$0xff]  ;;  %v1853_v3 = vld [vmem:[%s2173_s13 + $0x48] sm:$0xff]  ;;  %v1865_v5 = vld [vmem:[%s2173_s13 + $0x40] sm:$0xff] }
   0xd   :  { %v1871_v6 = vld [vmem:[%s2173_s13 + $0xb8] sm:$0xff]  ;;  %v1883_v8 = vld [vmem:[%s2173_s13 + $0xb0] sm:$0xff]  ;;  %v1895_v10 = vld [vmem:[%s2173_s13 + $0xa8] sm:$0xff] }
   0xe   :  { %v1877_v7 = vld [vmem:[%s2173_s13 + $0x38] sm:$0xff]  ;;  %v1889_v9 = vld [vmem:[%s2173_s13 + $0x30] sm:$0xff]  ;;  %v1901_v11 = vld [vmem:[%s2173_s13 + $0x28] sm:$0xff] }
   0xf   :  { %1385 = vmatpush3.bf16.msra.mxu0 %v1568_v18  ;;  %v1907_v12 = vld [vmem:[%s2173_s13 + $0xa0] sm:$0xff]  ;;  %v1919_v14 = vld [vmem:[%s2173_s13 + $0x98] sm:$0xff]  ;;  %v1931_v16 = vld [vmem:[%s2173_s13 + $0x90] sm:$0xff] }
  0x10   :  { %1386 = vmatprep.subr.bf16.mxu0 %v1569_v19  ;;  %v1913_v13 = vld [vmem:[%s2173_s13 + $0x20] sm:$0xff]  ;;  %v1925_v15 = vld [vmem:[%s2173_s13 + $0x18] sm:$0xff]  ;;  %v1937_v17 = vld [vmem:[%s2173_s13 + $0x10] sm:$0xff] }
  0x11   :  { %v1945_v18 = vld [vmem:[%s2173_s13 + $0x88] sm:$0xff] }
  0x12   :  { %v1951_v19 = vld [vmem:[%s2173_s13 + $0x8] sm:$0xff] }
  0x13   :  { %1387 = vmatpush3.bf16.msra.mxu0 %v1570_v20  ;;  %v1957_v20 = vld [vmem:[%s2173_s13 + $0x80] sm:$0xff] }
  0x14   :  { %1388 = vmatprep.subr.bf16.mxu0 %v1571_v21  ;;  %v1963_v21 = vld [vmem:[%s2173_s13] sm:$0xff]  ;;  %s1605_s13 = smov 4  }
  0x17   :  { %1389 = vmatpush3.bf16.msra.mxu0 %v1572_v22 }
  0x18   :  { %1390 = vmatprep.subr.bf16.mxu0 %v1573_v23 }
  0x1b   :  { %1391 = vmatpush3.bf16.msra.mxu0 %v1574_v24 }
  0x1c   :  { %1392 = vmatprep.subr.bf16.mxu0 %v1575_v25 }
  0x1f   :  { %1393 = vmatpush3.bf16.msra.mxu0 %v1576_v26 }
  0x20   :  { %1501 = vmatprep.subr.mxu0 %v1604_v44 }
  0x78   :  { %v1532_v27 = vpop.permute.xlu0 %1531 }
  0x79   :  { %v1542_v28 = vpop.permute.xlu1 %1541  ;;  %v1534_v29 = vunpack.i.h.bf16 %v1532_v27  ;;  %v1533_v30 = vunpack.i.l.bf16 %v1532_v27 }
  0x7a   :  { %v1544_v31 = vunpack.i.h.bf16 %v1542_v28  ;;  %v1543_v32 = vunpack.i.l.bf16 %v1542_v28 }
  0x7b   :  { %v101_v36 = vsel %vm99_vm1, 0.0, %v1534_v29  ;;  %v100_v37 = vsel %vm99_vm1, 0.0, %v1533_v30 }
  0x7c   :  { %v1537_v33 = vpop.permute.xlu0 %1536 }
  0x7d   :  { %v1539_v34 = vunpack.i.h.bf16 %v1537_v33  ;;  %v1538_v35 = vunpack.i.l.bf16 %v1537_v33 }
  0x7f   :  { %v126_v38 = vsel %vm123_vm2, %v1538_v35, %v1543_v32  ;;  %v127_v39 = vsel %vm123_vm2, %v1539_v34, %v1544_v31  ;;  %v124_v40 = vsel %vm123_vm2, %v100_v37, %v1538_v35  ;;  %v125_v41 = vsel %vm123_vm2, %v101_v36, %v1539_v34 }
  0x80   :  { %v129_v42 = vpack.c.bf16 %v127_v39, %v126_v38  ;;  %v128_v43 = vpack.c.bf16 %v125_v41, %v124_v40 }
  0x82   :  { %290 = vmatprep.mubr.bf16.mxu0 %v129_v42 }
  0x83   :  { %291 = vmatmul.mubr.bf16.vlgmr.msra.gmra.mxu0 %v128_v43 }
  0x84   :  { %1503 = vmatprep.mubr.msk.f32.mxu0 %vm1607_vm7, %v1604_v44 }
 0x143   :  { %v1394_v45 = vpop.f32.mrf.mxu0 }
 0x145   :  { %v1395_v46 = vpop.f32.mrf.mxu0 }
 0x146   :  { %v1757_v49 = vadd.f32 %v1395_v46, %v1394_v45 }
 0x147   :  { %v1397_v47 = vpop.f32.mrf.mxu0 }
 0x148   :  { %v299_v52 = vmul.f32 %v1757_v49, %v1757_v49 }
 0x149   :  { %v1398_v48 = vpop.f32.mrf.mxu0 }
 0x14a   :  { %v1759_v50 = vadd.f32 %v1398_v48, %v1397_v47 }
 0x14c   :  { %v300_v51 = vmul.f32 %v1759_v50, %v1759_v50 }
 0x14e   :  { %333 = vmatprep.subr.mxu1 %v300_v51  ;;  %v1606_v51 = vmov 1966171168  }
 0x14f   :  { %334 = vmatpush1.msra.mxu1 %v1759_v50 }
 0x150   :  { %335 = vmatprep.subr.mxu1 %v299_v52  ;;  %v476_v52 = vunpack.c.l.s4 %v1606_v51  ;;  %v1586_v51 = vld [vmem:[%s2177_s4 + $0x18] sm:$0xff]  }
 0x151   :  { %336 = vmatpush1.msra.mxu1 %v1757_v49 }
 0x152   :  { %1349 = vmatmul.mubr.msk.f32.vlgmr.msra.gmra.mxu1 %vm301_vm3, %v1769_v53  ;;  %1400 = vmatprep.subr.mxu1 %v1774_v54 }
 0x153   :  { %1401 = vmatpush3.msra.mxu1 %v1779_v55 }
 0x154   :  { %1402 = vmatprep.subr.mxu1 %v1785_v56 }
 0x155   :  { %1403 = vmatpush3.msra.mxu1 %v1793_v57 }
 0x156   :  { %1404 = vmatprep.subr.mxu1 %v1799_v58 }
 0x157   :  { %1405 = vmatpush3.msra.mxu1 %v1805_v59 }
 0x158   :  { %1406 = vmatprep.subr.mxu1 %v1811_v60 }
 0x159   :  { %1407 = vmatpush3.msra.mxu1 %v1817_v61 }
 0x15a   :  { %1408 = vmatprep.subr.mxu1 %v1823_v62 }
 0x15b   :  { %1409 = vmatpush3.msra.mxu1 %v1829_v63 }
 0x15c   :  { %1410 = vmatprep.subr.mxu1 %v1835_v0 }
 0x15d   :  { %1411 = vmatpush3.msra.mxu1 %v1841_v1 }
 0x15e   :  { %1412 = vmatprep.subr.mxu1 %v1847_v2 }
 0x15f   :  { %1413 = vmatpush3.msra.mxu1 %v1853_v3 }
 0x160   :  { %1414 = vmatprep.subr.mxu1 %v1859_v4 }
 0x161   :  { %1415 = vmatpush3.msra.mxu1 %v1865_v5 }
 0x162   :  { %1416 = vmatprep.subr.mxu1 %v1871_v6 }
 0x163   :  { %1417 = vmatpush3.msra.mxu1 %v1877_v7 }
 0x164   :  { %1418 = vmatprep.subr.mxu1 %v1883_v8 }
 0x165   :  { %1419 = vmatpush3.msra.mxu1 %v1889_v9 }
 0x166   :  { %1420 = vmatprep.subr.mxu1 %v1895_v10 }
 0x167   :  { %1421 = vmatpush3.msra.mxu1 %v1901_v11 }
 0x168   :  { %1422 = vmatprep.subr.mxu1 %v1907_v12 }
 0x169   :  { %1423 = vmatpush3.msra.mxu1 %v1913_v13 }
 0x16a   :  { %1424 = vmatprep.subr.mxu1 %v1919_v14 }
 0x16b   :  { %1425 = vmatpush3.msra.mxu1 %v1925_v15 }
 0x16c   :  { %1426 = vmatprep.subr.mxu1 %v1931_v16 }
 0x16d   :  { %1427 = vmatpush3.msra.mxu1 %v1937_v17 }
 0x16e   :  { %1428 = vmatprep.subr.mxu1 %v1945_v18 }
 0x16f   :  { %1429 = vmatpush3.msra.mxu1 %v1951_v19 }
 0x170   :  { %1430 = vmatprep.subr.mxu1 %v1957_v20 }
 0x171   :  { %1431 = vmatpush3.msra.mxu1 %v1963_v21 }
 0x212   :  { %v371_v22 = vpop.f32.mrf.mxu1 }
 0x214   :  { %v373_v23 = vpop.f32.mrf.mxu1 }
 0x215   :  { %440 = vmatprep.mubr.f32.mxu1 %v373_v23  ;;  %v477_v23 = vunpack.c.0.s8 %v476_v52  ;;  %v1587_v52 = vld [vmem:[%s2177_s4 + $0x50] sm:$0xff]  }
 0x216   :  { %441 = vmatmul.mubr.f32.vlgmr.msra.gmra.mxu1 %v371_v22  ;;  %v478_v22 = vlaneseq }
 0x2d6   :  { %v1432_v24 = vpop.f32.mrf.mxu1 }
 0x2d8   :  { %v1433_v25 = vpop.f32.mrf.mxu1 }
 0x2d9   :  { %v1434_v26 = vadd.f32 %v1433_v25, %v1432_v24  ;;  %v479_v24 = vshrl.u32 %v478_v22, 7  ;;  %v1588_v22 = vld [vmem:[%s2177_s4 + $0x10] sm:$0xff]  }
 0x2db   :  { %v447_v27 = vsel %vm446_vm4, %v1434_v26, 0.0  ;;  %v456_v36 = vsel %vm455_vm5, %v1434_v26, 0.0  ;;  %v1969_v25 = vsub.s32 %v477_v23, %v479_v24  ;;  %v1974_v26 = vld [vmem:[%s2174_s12] sm:$0xf]  ;;  %v589_v23 = vsub.s32 1, %v479_v24 }
 0x2dc   :  { %v448_v28 = vrot.slane %v447_v27, 4  ;;  %v457_v37 = vrot.slane %v456_v36, 4  ;;  %1502 = vmatpush3.msk.msra.mxu0 %vm507_vm6, %v1974_v26 }
 0x2de   :  { %v449_v29 = vadd.f32 %v448_v28, %v447_v27  ;;  %v458_v38 = vadd.f32 %v457_v37, %v456_v36 }
 0x2e0   :  { %v450_v30 = vrot.slane %v449_v29, 2  ;;  %v459_v39 = vrot.slane %v458_v38, 2 }
 0x2e2   :  { %v451_v31 = vadd.f32 %v450_v30, %v449_v29  ;;  %v460_v40 = vadd.f32 %v459_v39, %v458_v38  ;;  %v471_v30 = vld [vmem:[%s2175_s2] sm:$0x1] }
 0x2e4   :  { %v452_v32 = vrot.slane %v451_v31, 1  ;;  %v461_v41 = vrot.slane %v460_v40, 1 }
 0x2e6   :  { %v453_v33 = vadd.f32 %v452_v32, %v451_v31  ;;  %v462_v42 = vadd.f32 %v461_v41, %v460_v40  ;;  %v1577_v40 = vld [vmem:[%s2177_s4 + $0x78] sm:$0xff]  }
 0x2e7   :  { %v1578_v41 = vld [vmem:[%s2177_s4 + $0x38] sm:$0xff]   ;;  %1437 = vmatprep.subr.bf16.mxu1 %v1577_v40 }
 0x2e8   :  { %v454_v34 = vmul.f32 0.001953125, %v453_v33  ;;  %v463_v43 = vmul.f32 0.001953125, %v462_v42  ;;  %v493_v33 = vld [vmem:[%s2176_s3] sm:$0x1]  ;;  %1438 = vmatpush3.bf16.msra.mxu1 %v1578_v41  ;;  %v1580_v42 = vld [vmem:[%s2177_s4 + $0x30] sm:$0xff]  }
 0x2ea   :  { %v464_v35 = vmul.f32 %v454_v34, %v454_v34 }
 0x2ec   :  { %466 = vrot.lane.b32.xlu1 %v464_v35, %s1605_s13  ;;  %v1989_v35 = vsub.s32 0, %v479_v24  ;;  %v1591_v24 = vld [vmem:[%s2177_s4 + $0x40] sm:$0xff]  }
 0x35e   :  { %v467_v45 = vpop.permute.xlu1 %466 }
 0x35f   :  { %v469_v46 = vsub.f32 %v463_v43, %v467_v45  ;;  %v1581_v43 = vld [vmem:[%s2177_s4 + $0x68] sm:$0xff]  }
 0x360   :  { %v1582_v45 = vld [vmem:[%s2177_s4 + $0x28] sm:$0xff]  }
 0x361   :  { %v470_v47 = vmax.f32 %v469_v46, 0.0  ;;  %v1583_v46 = vld [vmem:[%s2177_s4 + $0x60] sm:$0xff]  }
 0x363   :  { %v472_v48 = vadd.f32 1e-05, %v470_v47  ;;  %v1584_v47 = vld [vmem:[%s2177_s4 + $0x20] sm:$0xff]  }
 0x365   :  { %1593 = vrsqrt.f32 %v472_v48  ;;  %v1585_v48 = vld [vmem:[%s2177_s4 + $0x58] sm:$0xff]  }
 0x372   :  { %v1594_v27 = vpop.eup %1593 }
 0x373   :  { %v481_v28 = vrot.slane %v1594_v27, %v1969_v25 }
 0x375   :  { %v488_v29 = vrot.slane %v481_v28, %v1969_v25 }
 0x377   :  { %489 = vrot.lane.b32.xlu0 %v488_v29, %s1608_s30  ;;  %v1589_v29 = vld [vmem:[%s2177_s4 + $0x48] sm:$0xff]  }
 0x3e9   :  { %v490_v31 = vpop.permute.xlu0 %489 }
 0x3ea   :  { %v492_v32 = vmul.f32 %v490_v31, %v471_v30  ;;  %v1590_v31 = vld [vmem:[%s2177_s4 + $0x8] sm:$0xff]  }
 0x3ec   :  { %v494_v36 = vmul.f32 %v492_v32, %v454_v34  ;;  %v1579_v34 = vld [vmem:[%s2177_s4 + $0x70] sm:$0xff]  }
 0x3ed   :  { %1439 = vmatprep.subr.bf16.mxu1 %v1579_v34 }
 0x3ee   :  { %v495_v37 = vsub.f32 %v493_v33, %v494_v36  ;;  %1440 = vmatpush3.bf16.msra.mxu1 %v1580_v42 }
 0x3ef   :  { %1441 = vmatprep.subr.bf16.mxu1 %v1581_v43 }
 0x3f0   :  { %v500_v38 = vrot.slane %v495_v37, %v1989_v35  ;;  %v1592_v37 = vld [vmem:[%s2177_s4] sm:$0xff]  }
 0x3f2   :  { %v502_v39 = vsel %vm99_vm1, %v492_v32, %v500_v38  ;;  %1442 = vmatpush3.bf16.msra.mxu1 %v1582_v45 }
 0x3f3   :  { %1504 = vmatmul.mubr.msk.f32.vlgmr.msra.gmra.mxu0 %vm503_vm8, %v502_v39  ;;  %1443 = vmatprep.subr.bf16.mxu1 %v1583_v46 }
 0x3f4   :  { %868 = vmatprep.mubr.f32.mxu0 %v1604_v44 }
 0x3f6   :  { %1444 = vmatpush3.bf16.msra.mxu1 %v1584_v47 }
 0x3f7   :  { %1445 = vmatprep.subr.bf16.mxu1 %v1585_v48 }
 0x3fa   :  { %1446 = vmatpush3.bf16.msra.mxu1 %v1586_v51 }
 0x3fb   :  { %1447 = vmatprep.subr.bf16.mxu1 %v1587_v52 }
 0x3fe   :  { %1448 = vmatpush3.bf16.msra.mxu1 %v1588_v22 }
 0x3ff   :  { %1449 = vmatprep.subr.bf16.mxu1 %v1589_v29 }
 0x402   :  { %1450 = vmatpush3.bf16.msra.mxu1 %v1590_v31 }
 0x403   :  { %1451 = vmatprep.subr.bf16.mxu1 %v1591_v24 }
 0x406   :  { %1452 = vmatpush3.bf16.msra.mxu1 %v1592_v37 }
 0x407   :  { %1506 = vmatprep.subr.mxu1 %v1604_v44 }
 0x4b3   :  { %v577_v27 = vpop.f32.mrf.mxu0 }
 0x4b4   :  { %v584_v28 = vrot.slane %v577_v27, %v1989_v35  ;;  %v590_v36 = vrot.slane %v577_v27, %v589_v23 }
 0x4b5   :  { %v1505_v30 = vpop.f32.mrf.mxu0 }
 0x4b6   :  { %v585_v32 = vmul.f32 %v1757_v49, %v584_v28  ;;  %v586_v33 = vmul.f32 %v1759_v50, %v584_v28 }
 0x4b8   :  { %v591_v38 = vadd.f32 %v590_v36, %v585_v32  ;;  %v592_v39 = vadd.f32 %v590_v36, %v586_v33 }
 0x4ba   :  { %v593_v40 = vmax.f32 %v591_v38, 0.0  ;;  %v594_v41 = vmax.f32 %v592_v39, 0.0 }
 0x4bc   :  { %v1545_v49 = vpack.i.bf16 %v594_v41, %v593_v40  ;;  %v597_v34 = vrot.slane %v593_v40, 7  ;;  %v598_v50 = vrot.slane %v594_v41, 7  ;;  %v607_v42 = vrot.slane %v593_v40, 1 }
 0x4bd   :  { %v608_v43 = vrot.slane %v594_v41, 1 }
 0x4be   :  { %1546 = vrot.lane.b32.xlu0 %v1545_v49, %s1603_s28  ;;  %v1550_v45 = vpack.i.bf16 %v598_v50, %v597_v34  ;;  %v611_v46 = vsel %vm106_vm0, %v607_v42, 0.0 }
 0x4bf   :  { %v612_v47 = vsel %vm106_vm0, %v608_v43, 0.0 }
 0x4c0   :  { %1551 = vrot.lane.b32.xlu1 %v1550_v45, %s1603_s28  ;;  %v1555_v48 = vpack.i.bf16 %v612_v47, %v611_v46  ;;  %v968_v47 = vld [vmem:[%s2180_s5] sm:$0x1] }
 0x4c4   :  { %1556 = vrot.lane.b32.xlu1 %v1555_v48, %s1603_s28 }
 0x530   :  { %v1547_v52 = vpop.permute.xlu0 %1546 }
 0x531   :  { %v1549_v29 = vunpack.i.h.bf16 %v1547_v52  ;;  %v1548_v30 = vunpack.i.l.bf16 %v1547_v52  ;;  %v990_v52 = vld [vmem:[%s2181_s6] sm:$0x1] }
 0x532   :  { %v1552_v51 = vpop.permute.xlu1 %1551 }
 0x533   :  { %v1554_v22 = vunpack.i.h.bf16 %v1552_v51  ;;  %v1553_v23 = vunpack.i.l.bf16 %v1552_v51 }
 0x535   :  { %v606_v27 = vsel %vm99_vm1, 0.0, %v1554_v22  ;;  %v605_v28 = vsel %vm99_vm1, 0.0, %v1553_v23 }
 0x536   :  { %v1557_v31 = vpop.permute.xlu1 %1556  ;;  %v628_v36 = vsel %vm123_vm2, %v606_v27, %v1549_v29  ;;  %v627_v24 = vsel %vm123_vm2, %v605_v28, %v1548_v30 }
 0x537   :  { %v1559_v32 = vunpack.i.h.bf16 %v1557_v31  ;;  %v1558_v33 = vunpack.i.l.bf16 %v1557_v31  ;;  %v631_v40 = vpack.c.bf16 %v628_v36, %v627_v24  ;;  %v1369_v36 = vld [vmem:[%s2183_s8] ss:$0 sm:$0xff] }
 0x539   :  { %v629_v37 = vsel %vm123_vm2, %v1548_v30, %v1558_v33  ;;  %v630_v38 = vsel %vm123_vm2, %v1549_v29, %v1559_v32  ;;  %v1107_v32 = vld [vmem:[%s2182_s10 + $0x8] sm:$0xff]  ;;  %v1106_v33 = vld [vmem:[%s2182_s10] sm:$0xff] }
 0x53a   :  { %v632_v39 = vpack.c.bf16 %v630_v38, %v629_v37 }
 0x53c   :  { %793 = vmatprep.mubr.bf16.mxu1 %v632_v39 }
 0x53d   :  { %794 = vmatmul.mubr.bf16.vlgmr.msra.gmra.mxu1 %v631_v40 }
 0x53e   :  { %1508 = vmatprep.mubr.msk.f32.mxu1 %vm1607_vm7, %v1604_v44 }
 0x5fd   :  { %v1453_v41 = vpop.f32.mrf.mxu1 }
 0x5ff   :  { %v1454_v49 = vpop.f32.mrf.mxu1 }
 0x600   :  { %v2060_v42 = vadd.f32 %v1454_v49, %v1453_v41 }
 0x601   :  { %v1456_v34 = vpop.f32.mrf.mxu1 }
 0x602   :  { %v802_v46 = vmul.f32 %v2060_v42, %v2060_v42 }
 0x603   :  { %v1457_v50 = vpop.f32.mrf.mxu1 }
 0x604   :  { %v2062_v43 = vadd.f32 %v1457_v50, %v1456_v34  ;;  %v1373_v34 = vld [vmem:[%s2184_s11] ss:$0 sm:$0xff] }
 0x606   :  { %v803_v45 = vmul.f32 %v2062_v43, %v2062_v43 }
 0x608   :  { %832 = vmatprep.subr.mxu0 %v803_v45 }
 0x609   :  { %833 = vmatpush1.msra.mxu0 %v2062_v43 }
 0x60a   :  { %834 = vmatprep.subr.mxu0 %v802_v46 }
 0x60b   :  { %835 = vmatpush1.msra.mxu0 %v2060_v42 }
 0x60c   :  { %1368 = vmatmul.mubr.msk.f32.vlgmr.msra.gmra.mxu0 %vm301_vm3, %v1769_v53  ;;  %1459 = vmatprep.subr.mxu0 %v1774_v54 }
 0x60d   :  { %1460 = vmatpush3.msra.mxu0 %v1779_v55 }
 0x60e   :  { %1461 = vmatprep.subr.mxu0 %v1785_v56 }
 0x60f   :  { %1462 = vmatpush3.msra.mxu0 %v1793_v57 }
 0x610   :  { %1463 = vmatprep.subr.mxu0 %v1799_v58 }
 0x611   :  { %1464 = vmatpush3.msra.mxu0 %v1805_v59 }
 0x612   :  { %1465 = vmatprep.subr.mxu0 %v1811_v60 }
 0x613   :  { %1466 = vmatpush3.msra.mxu0 %v1817_v61 }
 0x614   :  { %1467 = vmatprep.subr.mxu0 %v1823_v62 }
 0x615   :  { %1468 = vmatpush3.msra.mxu0 %v1829_v63 }
 0x616   :  { %1469 = vmatprep.subr.mxu0 %v1835_v0 }
 0x617   :  { %1470 = vmatpush3.msra.mxu0 %v1841_v1 }
 0x618   :  { %1471 = vmatprep.subr.mxu0 %v1847_v2 }
 0x619   :  { %1472 = vmatpush3.msra.mxu0 %v1853_v3 }
 0x61a   :  { %1473 = vmatprep.subr.mxu0 %v1859_v4 }
 0x61b   :  { %1474 = vmatpush3.msra.mxu0 %v1865_v5 }
 0x61c   :  { %1475 = vmatprep.subr.mxu0 %v1871_v6 }
 0x61d   :  { %1476 = vmatpush3.msra.mxu0 %v1877_v7 }
 0x61e   :  { %1477 = vmatprep.subr.mxu0 %v1883_v8 }
 0x61f   :  { %1478 = vmatpush3.msra.mxu0 %v1889_v9 }
 0x620   :  { %1479 = vmatprep.subr.mxu0 %v1895_v10 }
 0x621   :  { %1480 = vmatpush3.msra.mxu0 %v1901_v11 }
 0x622   :  { %1481 = vmatprep.subr.mxu0 %v1907_v12 }
 0x623   :  { %1482 = vmatpush3.msra.mxu0 %v1913_v13 }
 0x624   :  { %1483 = vmatprep.subr.mxu0 %v1919_v14 }
 0x625   :  { %1484 = vmatpush3.msra.mxu0 %v1925_v15 }
 0x626   :  { %1485 = vmatprep.subr.mxu0 %v1931_v16 }
 0x627   :  { %1486 = vmatpush3.msra.mxu0 %v1937_v17  ;;  %v1008_v17 = vld [vmem:[%s2178_s7] sm:$0xf] }
 0x628   :  { %1487 = vmatprep.subr.mxu0 %v1945_v18  ;;  %1507 = vmatpush3.msk.msra.mxu1 %vm507_vm6, %v1008_v17 }
 0x629   :  { %1488 = vmatpush3.msra.mxu0 %v1951_v19  ;;  %v1609_v19 = vmov 0   ;;  %1518 = vmatprep.subr.mxu1 %v1604_v44 }
 0x62a   :  { %1489 = vmatprep.subr.mxu0 %v1957_v20  ;;  %1560 = vset.pattern.permute.xlu0 %v1609_v19  ;;  %v20_v20 = vstv %s2179_s9 }
 0x62b   :  { %1490 = vmatpush3.msra.mxu0 %v1963_v21  ;;  %21 = vst [vmem:[#allocation2] sm:$0x1] %v20_v20 }
 0x62c   :  { %1511 = vmatprep.subr.mxu0 %v1604_v44 }
 0x632   :  { %v1372_v21 = vld [vmem:[#allocation2] ss:$0 sm:$0xff] }
 0x6cc   :  { %v870_v53 = vpop.f32.mrf.mxu0 }
 0x6ce   :  { %v872_v54 = vpop.f32.mrf.mxu0 }
 0x6cf   :  { %939 = vmatprep.mubr.f32.mxu0 %v872_v54 }
 0x6d0   :  { %940 = vmatmul.mubr.f32.vlgmr.msra.gmra.mxu0 %v870_v53 }
 0x6d1   :  { %1515 = vmatprep.mubr.msk.f32.mxu0 %vm1607_vm7, %v1604_v44  ;;  %1512 = vmatpush3.msra.mxu0 %v1107_v32 }
 0x6d2   :  { %1513 = vmatprep.subr.mxu0 %v1604_v44 }
 0x6d3   :  { %1514 = vmatpush3.msra.mxu0 %v1106_v33 }
 0x790   :  { %v1491_v55 = vpop.f32.mrf.mxu0 }
 0x792   :  { %v1492_v56 = vpop.f32.mrf.mxu0 }
 0x793   :  { %v1493_v57 = vadd.f32 %v1492_v56, %v1491_v55 }
 0x795   :  { %v945_v58 = vsel %vm446_vm4, %v1493_v57, 0.0  ;;  %v953_v3 = vsel %vm455_vm5, %v1493_v57, 0.0  ;;  %v993_v27 = vmul.f32 0.00390625, %v1493_v57 }
 0x796   :  { %v946_v59 = vrot.slane %v945_v58, 4  ;;  %v954_v4 = vrot.slane %v953_v3, 4 }
 0x798   :  { %v947_v60 = vadd.f32 %v946_v59, %v945_v58  ;;  %v955_v5 = vadd.f32 %v954_v4, %v953_v3 }
 0x79a   :  { %v948_v61 = vrot.slane %v947_v60, 2  ;;  %v956_v6 = vrot.slane %v955_v5, 2 }
 0x79c   :  { %v949_v62 = vadd.f32 %v948_v61, %v947_v60  ;;  %v957_v7 = vadd.f32 %v956_v6, %v955_v5 }
 0x79e   :  { %v950_v63 = vrot.slane %v949_v62, 1  ;;  %v958_v8 = vrot.slane %v957_v7, 1 }
 0x7a0   :  { %v951_v0 = vadd.f32 %v950_v63, %v949_v62  ;;  %v959_v9 = vadd.f32 %v958_v8, %v957_v7 }
 0x7a2   :  { %v952_v1 = vmul.f32 0.001953125, %v951_v0  ;;  %v960_v10 = vmul.f32 0.001953125, %v959_v9 }
 0x7a4   :  { %v961_v2 = vmul.f32 %v952_v1, %v952_v1 }
 0x7a6   :  { %963 = vrot.lane.b32.xlu0 %v961_v2, %s1605_s13 }
 0x7aa   :  { %1101 = vperm.xlu0 %1560, %v1372_v21  }
 0x818   :  { %v964_v11 = vpop.permute.xlu0 %963 }
 0x819   :  { %v966_v12 = vsub.f32 %v960_v10, %v964_v11 }
 0x81b   :  { %v967_v13 = vmax.f32 %v966_v12, 0.0 }
 0x81d   :  { %v969_v14 = vadd.f32 1e-05, %v967_v13  ;;  %v1602_v13 = vld [vmem:[%s2170_s0 + $0x8] sm:$0xff] }
 0x81f   :  { %1595 = vrsqrt.f32 %v969_v14 }
 0x825   :  { %v1102_v38 = vpop.permute.xlu0 %1101 }
 0x82c   :  { %v1596_v15 = vpop.eup %1595 }
 0x82d   :  { %v978_v16 = vrot.slane %v1596_v15, %v1969_v25 }
 0x82f   :  { %v985_v18 = vrot.slane %v978_v16, %v1969_v25 }
 0x831   :  { %986 = vrot.lane.b32.xlu1 %v985_v18, %s1608_s30 }
 0x8a3   :  { %v987_v48 = vpop.permute.xlu1 %986 }
 0x8a4   :  { %v989_v51 = vmul.f32 %v987_v48, %v968_v47 }
 0x8a6   :  { %v991_v22 = vmul.f32 %v989_v51, %v952_v1  ;;  %v998_v23 = vrot.slane %v989_v51, %v1989_v35 }
 0x8a8   :  { %v992_v28 = vsub.f32 %v990_v52, %v991_v22  ;;  %v1000_v29 = vmul.f32 %v998_v23, %v993_v27 }
 0x8aa   :  { %v1005_v30 = vrot.slane %v992_v28, %v1989_v35 }
 0x8ac   :  { %v1007_v31 = vadd.f32 %v1005_v30, %v1000_v29 }
 0x8ae   :  { %1509 = vmatmul.mubr.msk.f32.vlgmr.msra.gmra.mxu1 %vm503_vm8, %v1007_v31 }
 0x8af   :  { %1519 = vmatpush3.msk.msra.mxu1 %vm507_vm6, %v1974_v26  ;;  %1520 = vmatprep.mubr.msk.f32.mxu1 %vm1607_vm7, %v1604_v44 }
 0x96e   :  { %v1088_v26 = vpop.f32.mrf.mxu1 }
 0x96f   :  { %v1089_v24 = vadd.f32 %v1369_v36, %v1088_v26 }
 0x970   :  { %v1510_v37 = vpop.f32.mrf.mxu1 }
 0x971   :  { %v1094_v39 = vmin.f32 %v1089_v24, 0.0  ;;  %v1092_v40 = vmax.f32 %v1089_v24, 0.0 }
 0x973   :  { %v1104_v41 = vmul.f32 %v1102_v38, %v1094_v39 }
 0x975   :  { %v1105_v49 = vadd.f32 %v1104_v41, %v1092_v40 }
 0x977   :  { %1516 = vmatmul.mubr.msk.f32.vlgmr.msra.gmra.mxu0 %vm301_vm3, %v1105_v49 }
 0xa37   :  { %v1184_v44 = vpop.f32.mrf.mxu0 }
 0xa38   :  { %v1185_v50 = vadd.f32 %v1373_v34, %v1184_v44 }
 0xa39   :  { %v1517_v45 = vpop.f32.mrf.mxu0 }
 0xa3a   :  { %v1375_v46 = vmul.f32 -1.442695, %v1185_v50 }
 0xa3c   :  { %1597 = vpow2.f32 %v1375_v46 }
 0xa49   :  { %v1598_v53 = vpop.eup %1597 }
 0xa4a   :  { %v1191_v54 = vadd.f32 1.0, %v1598_v53 }
 0xa4c   :  { %1599 = vrcp.f32 %v1191_v54 }
 0xa59   :  { %v1600_v55 = vpop.eup %1599 }
 0xa5a   :  { %v1195_v56 = vmul.f32 %v1600_v55, %v1005_v30  ;;  %v1194_v57 = vmul.f32 %v1600_v55, %v998_v23 }
 0xa5c   :  { %v1197_v58 = vrot.slane %v1195_v56, 6 }
 0xa5e   :  { %v1200_v59 = vsel %vm1199_vm9, %v1194_v57, %v1197_v58 }
 0xa5f   :  { %1521 = vmatmul.mubr.msk.f32.vlgmr.msra.gmra.mxu1 %vm503_vm8, %v1200_v59 }
 0xb1f   :  { %v1270_v60 = vpop.f32.mrf.mxu1 }
 0xb20   :  { %v1281_v61 = vrot.slane %v1270_v60, %v1969_v25 }
 0xb21   :  { %v1522_v62 = vpop.f32.mrf.mxu1 }
 0xb22   :  { %v1282_v63 = vcombine.high %v1281_v61, %v1281_v61  ;;  %v1289_v0 = vrot.slane %v1281_v61, %v1969_v25 }
 0xb24   :  { %v1296_v1 = vrot.slane %v1282_v63, %v1969_v25  ;;  %v1297_v2 = vcombine.high %v1289_v0, %v1289_v0  ;;  %v1302_v3 = vrot.slane %v1289_v0, %v1989_v35  ;;  %v1601_v25 = vld [vmem:[%s2170_s0] sm:$0xff] }
 0xb26   :  { %v1298_v4 = vcombine.high %v1296_v1, %v1296_v1  ;;  %v1306_v5 = vrot.slane %v1296_v1, %v1989_v35  ;;  %v1309_v6 = vmul.f32 %v2060_v42, %v1302_v3  ;;  %v1314_v7 = vrot.slane %v1297_v2, %v1989_v35 }
 0xb28   :  { %v1310_v8 = vmul.f32 %v2062_v43, %v1306_v5  ;;  %v1318_v9 = vrot.slane %v1298_v4, %v1989_v35  ;;  %v1321_v10 = vadd.f32 %v1314_v7, %v1309_v6 }
 0xb2a   :  { %v1322_v11 = vadd.f32 %v1318_v9, %v1310_v8  ;;  %v1323_v12 = vadd.f32 %v1601_v25, %v1321_v10 }
 0xb2c   :  { %v1324_v14 = vadd.f32 %v1602_v13, %v1322_v11  ;;  %v1325_v15 = vmax.f32 %v1323_v12, 0.0 }
 0xb2e   :  { %v1326_v42 = vmax.f32 %v1324_v14, 0.0  ;;  %1327 = vst [vmem:[%s2185_s15] sm:$0xff] %v1325_v15 }
 0xb30   :  { %1328 = vst [vmem:[%s2185_s15 + $0x8] sm:$0xff] %v1326_v42 }

</bundles_post_ra>
